<compile_context>
chip_gen: v6e
topology: v6e:2x2x1
jax: 0.10.0
libtpu: 0.0.40
codegen_flags: <defaults>
</compile_context>

<pallas_src>
import functools
from typing import NamedTuple

import jax
import jax.numpy as jnp
from jax.experimental import pallas as pl
from jax.experimental.pallas import tpu as pltpu


def _round_up(x, m):
    return ((x + m - 1) // m) * m


@functools.lru_cache(maxsize=None)
def _vmem_limit_bytes():
    """min(100 MiB, 3/4 of physical VMEM); conservative 48 MiB if query fails."""
    cap = 64 * 1024 * 1024  # conservative fallback = v7x per-TC VMEM
    try:
        cap = int(pltpu.get_tpu_info().vmem_capacity_bytes)
    except Exception:
        pass
    return int(min(100 * 1024 * 1024, (cap * 3) // 4))


class DecoderDims(NamedTuple):
    H: int        # true hidden size
    V: int        # true vocab size
    Hp: int       # padded hidden (multiple of 128)
    Vp: int       # padded vocab  (multiple of tile_v)
    tile_v: int   # vocab tile width (multiple of 128)


# ----------------------------------------------------------------------------------
# Kernel 1: GRU cell + dot attention + context + concat-Linear (single block)
# ----------------------------------------------------------------------------------
def _gru_attn_kernel(emb_ref, h_ref, enc_t_ref, enc_ref, smask_ref,
                     wih_t_ref, whh_t_ref, bih_ref, bhh_ref,
                     wch_t_ref, wcc_t_ref, bcat_ref,
                     co_ref, ctx_ref, hid_ref, attn_ref):
    Bp, Hp = h_ref.shape
    Sp = enc_ref.shape[1]

    x = emb_ref[...]                      # (Bp, Hp) embedded input
    h = h_ref[...]                        # (Bp, Hp) previous hidden (layer 0)

    # ---- GRU cell (PyTorch gate order r, z, n); gate slices are 128-aligned ----
    gi = jnp.dot(x, wih_t_ref[...], preferred_element_type=jnp.float32) + bih_ref[...]
    gh = jnp.dot(h, whh_t_ref[...], preferred_element_type=jnp.float32) + bhh_ref[...]
    r = jax.nn.sigmoid(gi[:, 0 * Hp:1 * Hp] + gh[:, 0 * Hp:1 * Hp])
    z = jax.nn.sigmoid(gi[:, 1 * Hp:2 * Hp] + gh[:, 1 * Hp:2 * Hp])
    n = jnp.tanh(gi[:, 2 * Hp:3 * Hp] + r * gh[:, 2 * Hp:3 * Hp])
    h_new = (1.0 - z) * n + z * h                                         # (Bp, Hp)

    # ---- 'dot' attention: (1,Hp)@(Hp,Sp) per batch on the MXU.
    # enc_t is pre-transposed once per sequence, so no in-kernel enc transpose. ----
    q = h_new.reshape(Bp, 1, Hp)                                          # (Bp, 1, Hp)
    scores = jnp.einsum('bqh,bhs->bqs', q, enc_t_ref[...],
                        preferred_element_type=jnp.float32)               # (Bp, 1, Sp)
    scores = scores + smask_ref[...]                                      # mask padded S

    m = jnp.max(scores, axis=-1, keepdims=True)
    e = jnp.exp(scores - m)
    denom = jnp.sum(e, axis=-1, keepdims=True)
    inv = pl.reciprocal(denom, approx=True)        # EUP slot (essentially free)
    inv = inv * (2.0 - denom * inv)                # 1 Newton step -> ~f32 accuracy
    attn = e * inv                                                        # (Bp, 1, Sp)

    # ---- context = attn @ encoder_outputs (MXU, contraction over sublane axis S) ----
    ctx = jnp.einsum('bqs,bsh->bqh', attn, enc_ref[...],
                     preferred_element_type=jnp.float32).reshape(Bp, Hp)  # (Bp, Hp)

    # ---- concat -> Linear(2H, H) -> tanh, as two dots (no lane-axis concatenate) ----
    co = jnp.tanh(
        jnp.dot(h_new, wch_t_ref[...], preferred_element_type=jnp.float32)
        + jnp.dot(ctx, wcc_t_ref[...], preferred_element_type=jnp.float32)
        + bcat_ref[...])                                                  # (Bp, Hp)

    co_ref[...] = co
    ctx_ref[...] = ctx
    hid_ref[...] = h_new
    attn_ref[...] = attn.reshape(Bp, Sp)           # lane/sublane-dense 2-D output


# ----------------------------------------------------------------------------------
# Kernel 2: output projection Linear(H, V), tiled over V (bf16 weight stream)
# ----------------------------------------------------------------------------------
def _vocab_proj_kernel(co_ref, w_ref, b_ref, out_ref):
    co = co_ref[...].astype(w_ref.dtype)     # cast to bf16 only at the matmul
    out_ref[...] = (jnp.dot(co, w_ref[...], preferred_element_type=jnp.float32)
                    + b_ref[...])


# ----------------------------------------------------------------------------------
# One-time weight prep (hoisted out of the per-token decode loop)
# ----------------------------------------------------------------------------------
def prepare_decoder_params(params, vocab_weight_dtype=jnp.bfloat16):
    H = params["hidden_size"]
    V = params["output_size"]
    Hp = _round_up(H, 128)
    # Wide V slabs amortize per-grid-step overhead and push the weight-stream DMA
    # toward HBM roofline; an (Hp, tile_v) slab stays tiny vs VMEM even double-buffered.
    tile_v = min(2048, _round_up(V, 128))
    Vp = _round_up(V, tile_v)

    def pad2(w, r, c):
        return jnp.zeros((r, c), w.dtype).at[:w.shape[0], :w.shape[1]].set(w)

    def pad_gru_w(w):                      # (3H, H) -> transposed + per-gate-padded (Hp, 3Hp)
        w3 = w.reshape(3, H, H)
        w3p = jnp.zeros((3, Hp, Hp), w.dtype).at[:, :H, :H].set(w3)
        return jnp.transpose(w3p, (2, 0, 1)).reshape(Hp, 3 * Hp)

    def pad_gru_b(b):                      # (3H,) -> (1, 3Hp), per-gate-padded
        b3 = b.reshape(3, H)
        return jnp.zeros((3, Hp), b.dtype).at[:, :H].set(b3).reshape(1, 3 * Hp)

    wc = params["w_concat"]                # (H, 2H); split to kill the lane-axis concat
    prep = {
        "embedding_p": pad2(params["embedding"], V, Hp),          # (V, Hp)
        "wih_t": pad_gru_w(params["w_ih"]),                       # (Hp, 3Hp)
        "whh_t": pad_gru_w(params["w_hh"]),                       # (Hp, 3Hp)
        "bih": pad_gru_b(params["b_ih"]),                         # (1, 3Hp)
        "bhh": pad_gru_b(params["b_hh"]),                         # (1, 3Hp)
        "wch_t": pad2(wc[:, :H].T, Hp, Hp),                       # multiplies h_new
        "wcc_t": pad2(wc[:, H:].T, Hp, Hp),                       # multiplies context
        "bcat": pad2(params["b_concat"].reshape(1, H), 1, Hp),
        "wout_t": pad2(params["w_out"].T, Hp, Vp).astype(vocab_weight_dtype),  # (Hp, Vp)
        "bout": pad2(params["b_out"].reshape(1, V), 1, Vp),       # f32 bias
    }
    return prep, DecoderDims(H, V, Hp, Vp, tile_v)


def prepare_encoder_outputs(encoder_outputs, dims):
    """Once per source sequence: (S, B, H) -> padded (Bp,Hp,Sp) + (Bp,Sp,Hp) + mask.

    Two layouts of the encoder are kept so neither the score nor the context
    contraction needs an in-kernel transpose. (On v7x's 64 MiB VMEM, very long
    sequences would instead accept one transpose or S-tile the attention.)"""
    S, B, H = encoder_outputs.shape
    Bp = _round_up(B, 8)
    Sp = _round_up(S, 128)
    enc = jnp.transpose(encoder_outputs, (1, 0, 2))               # (B, S, H), once per seq
    enc_p = jnp.zeros((Bp, Sp, dims.Hp), jnp.float32).at[:B, :S, :H].set(enc)
    enc_t_p = jnp.transpose(enc_p, (0, 2, 1))                     # (Bp, Hp, Sp)
    smask = jnp.where(jnp.arange(Sp) < S, 0.0, -1e30).astype(jnp.float32).reshape(1, 1, Sp)
    return enc_t_p, enc_p, smask, S


# ----------------------------------------------------------------------------------
# Padded-state decode step (what a decode loop should call repeatedly)
# ----------------------------------------------------------------------------------
def _decoder_step(prep, dims, ids_p, h_p, enc_t_p, enc_p, smask):
    H, V, Hp, Vp, tile_v = dims
    Bp = h_p.shape[0]
    Sp = enc_p.shape[1]

    # glue: embedding gather (eval-mode dropout = identity)
    emb_p = prep["embedding_p"][ids_p]                                    # (Bp, Hp)

    vmem = pl.BlockSpec(memory_space=pltpu.MemorySpace.VMEM)
    vlimit = _vmem_limit_bytes()

    flops1 = 2 * Bp * (2 * Hp * 3 * Hp + 2 * Sp * Hp + 2 * Hp * Hp)
    bytes1 = 4 * (2 * Bp * Sp * Hp + 2 * Hp * 3 * Hp + 2 * Hp * Hp
                  + 5 * Bp * Hp + 2 * Bp * Sp + Sp + 2 * 3 * Hp + Hp)

    co, ctx_p, h_new_p, attn_p = pl.pallas_call(
        _gru_attn_kernel,
        out_shape=(jax.ShapeDtypeStruct((Bp, Hp), jnp.float32),    # co (concat output)
                   jax.ShapeDtypeStruct((Bp, Hp), jnp.float32),    # context
                   jax.ShapeDtypeStruct((Bp, Hp), jnp.float32),    # new hidden
                   jax.ShapeDtypeStruct((Bp, Sp), jnp.float32)),   # attention weights
        in_specs=[vmem] * 12,
        out_specs=(vmem, vmem, vmem, vmem),
        input_output_aliases={1: 2},   # recurrent state updated in place (h_p -> hidden)
        cost_estimate=pl.CostEstimate(flops=flops1,
                                      transcendentals=Bp * (4 * Hp + Sp),
                                      bytes_accessed=bytes1),
        compiler_params=pltpu.CompilerParams(vmem_limit_bytes=vlimit),
    )(emb_p, h_p, enc_t_p, enc_p, smask,
      prep["wih_t"], prep["whh_t"], prep["bih"], prep["bhh"],
      prep["wch_t"], prep["wcc_t"], prep["bcat"])

    # ---- vocab projection, tiled over V; V-tiles shard across TensorCores ----
    w_bytes = Hp * Vp * jnp.dtype(prep["wout_t"].dtype).itemsize
    logits_p = pl.pallas_call(
        _vocab_proj_kernel,
        out_shape=jax.ShapeDtypeStruct((Bp, Vp), jnp.float32),
        grid=(Vp // tile_v,),
        in_specs=[pl.BlockSpec((Bp, Hp), lambda j: (0, 0)),
                  pl.BlockSpec((Hp, tile_v), lambda j: (0, j)),
                  pl.BlockSpec((1, tile_v), lambda j: (0, j))],
        out_specs=pl.BlockSpec((Bp, tile_v), lambda j: (0, j)),
        compiler_params=pltpu.CompilerParams(
            dimension_semantics=("parallel",),
            vmem_limit_bytes=vlimit),
        cost_estimate=pl.CostEstimate(
            flops=2 * Bp * Hp * Vp, transcendentals=0,
            bytes_accessed=w_bytes + 4 * (Bp * Hp + Bp * Vp + Vp)),
    )(co, prep["wout_t"], prep["bout"])

    return logits_p, ctx_p, h_new_p, attn_p


# Padded-state API for autoregressive decode loops: feed h_new_p straight back as the
# next step's h_p (keeps the in-place alias effective); slice once at end of decoding.
decoder_step_padded = jax.jit(_decoder_step, static_argnums=(1,))


# ----------------------------------------------------------------------------------
# Module-semantics forward (matches the PyTorch LuongAttnDecoderRNN.forward)
# ----------------------------------------------------------------------------------
@functools.partial(jax.jit, static_argnums=(1, 2))
def _forward_jit(prep, dims, seq_len, input_seq, last_hidden, enc_t_p, enc_p, smask):
    H, V, Hp, Vp, tile_v = dims
    B = input_seq.shape[0]
    Bp = enc_p.shape[0]

    ids_p = jnp.zeros((Bp,), jnp.int32).at[:B].set(input_seq.astype(jnp.int32))
    h0_p = jnp.zeros((Bp, Hp), jnp.float32).at[:B, :H].set(last_hidden[0])

    logits_p, ctx_p, h_new_p, attn_p = _decoder_step(
        prep, dims, ids_p, h0_p, enc_t_p, enc_p, smask)

    output = logits_p[:B, :V]
    context = ctx_p[:B, :H]
    hidden = h_new_p[:B, :H][None, :, :]            # (1, B, H)
    attn_weights = attn_p[:B, None, :seq_len]       # (B, 1, S)
    return output, context, hidden, attn_weights


def luong_attn_decoder_forward(prep, dims, input_seq, last_context, last_hidden,
                               enc_prepped):
    """Forward of LuongAttnDecoderRNN ('dot', n_layers=1). `last_context` is unused,
    matching the PyTorch module."""
    del last_context
    enc_t_p, enc_p, smask, seq_len = enc_prepped
    return _forward_jit(prep, dims, seq_len, input_seq, last_hidden, enc_t_p, enc_p, smask)


# ----------------------------------------------------------------------------------
# Pure-JAX reference (mirrors the PyTorch forward) + param init
# ----------------------------------------------------------------------------------
def _reference_forward(params, input_seq, last_hidden, encoder_outputs):
    H = params["hidden_size"]
    x = params["embedding"][input_seq]                       # (B, H)
    h = last_hidden[0]
    gi = x @ params["w_ih"].T + params["b_ih"]
    gh = h @ params["w_hh"].T + params["b_hh"]
    r = jax.nn.sigmoid(gi[:, :H] + gh[:, :H])
    z = jax.nn.sigmoid(gi[:, H:2 * H] + gh[:, H:2 * H])
    n = jnp.tanh(gi[:, 2 * H:] + r * gh[:, 2 * H:])
    h_new = (1.0 - z) * n + z * h                            # (B, H)
    scores = jnp.einsum("bh,sbh->bs", h_new, encoder_outputs)
    attn = jax.nn.softmax(scores, axis=-1)                   # (B, S)
    ctx = jnp.einsum("bs,sbh->bh", attn, encoder_outputs)
    cat = jnp.concatenate([h_new, ctx], axis=1)
    co = jnp.tanh(cat @ params["w_concat"].T + params["b_concat"])
    out = co @ params["w_out"].T + params["b_out"]
    return out, ctx, h_new[None], attn[:, None, :]


def init_params(key, hidden_size, output_size):
    H, V = hidden_size, output_size
    ks = jax.random.split(key, 10)
    u = lambda k, shape, bound: jax.random.uniform(k, shape, jnp.float32, -bound, bound)
    gru_b = 1.0 / jnp.sqrt(H)
    return {
        "hidden_size": H,
        "output_size": V,
        "embedding": jax.random.normal(ks[0], (V, H), jnp.float32),
        "w_ih": u(ks[1], (3 * H, H), gru_b),
        "w_hh": u(ks[2], (3 * H, H), gru_b),
        "b_ih": u(ks[3], (3 * H,), gru_b),
        "b_hh": u(ks[4], (3 * H,), gru_b),
        "w_concat": u(ks[5], (H, 2 * H), 1.0 / jnp.sqrt(2 * H)),
        "b_concat": u(ks[6], (H,), 1.0 / jnp.sqrt(2 * H)),
        "w_out": u(ks[7], (V, H), 1.0 / jnp.sqrt(H)),
        "b_out": u(ks[8], (V,), 1.0 / jnp.sqrt(H)),
    }


if __name__ == "__main__":
    B, S, H, V = 2, 8, 32, 16

    key = jax.random.PRNGKey(0)
    kp, k1, k2, k3 = jax.random.split(key, 4)
    params = init_params(kp, H, V)

    input_seq = jax.random.randint(k1, (B,), 0, V, dtype=jnp.int32)           # (B,)
    last_context = jnp.zeros((B, H), jnp.float32)                             # unused (as in PyTorch)
    last_hidden = jax.random.normal(k2, (1, B, H), jnp.float32)               # (1, B, H)
    encoder_outputs = jax.random.normal(k3, (S, B, H), jnp.float32)           # (S, B, H)

    ref_out, ref_ctx, ref_hid, ref_attn = _reference_forward(
        params, input_seq, last_hidden, encoder_outputs)

    tight = dict(atol=1e-4, rtol=1e-4)

    # ---- default path: bf16-streamed vocab weights (halves kernel-2 HBM traffic) ----
    prep, dims = prepare_decoder_params(params)               # vocab_weight_dtype=bf16
    enc_prepped = prepare_encoder_outputs(encoder_outputs, dims)
    output, context, hidden, attn_weights = jax.block_until_ready(
        luong_attn_decoder_forward(prep, dims, input_seq, last_context,
                                   last_hidden, enc_prepped))
    assert output.shape == (B, V) and context.shape == (B, H)
    assert hidden.shape == (1, B, H) and attn_weights.shape == (B, 1, S)
    # logits compared with bf16-weight tolerance; everything else is full f32
    assert jnp.allclose(output, ref_out, atol=5e-2, rtol=5e-2), \
        float(jnp.max(jnp.abs(output - ref_out)))
    assert jnp.allclose(context, ref_ctx, **tight), float(jnp.max(jnp.abs(context - ref_ctx)))
    assert jnp.allclose(hidden, ref_hid, **tight), float(jnp.max(jnp.abs(hidden - ref_hid)))
    assert jnp.allclose(attn_weights, ref_attn, **tight), \
        float(jnp.max(jnp.abs(attn_weights - ref_attn)))

    # ---- f32-weight path: exact comparison against the f32 reference ----
    prep32, dims32 = prepare_decoder_params(params, vocab_weight_dtype=jnp.float32)
    enc_prepped32 = prepare_encoder_outputs(encoder_outputs, dims32)
    out32, ctx32, hid32, attn32 = jax.block_until_ready(
        luong_attn_decoder_forward(prep32, dims32, input_seq, last_context,
                                   last_hidden, enc_prepped32))
    assert jnp.allclose(out32, ref_out, **tight), float(jnp.max(jnp.abs(out32 - ref_out)))
    assert jnp.allclose(ctx32, ref_ctx, **tight), float(jnp.max(jnp.abs(ctx32 - ref_ctx)))
    assert jnp.allclose(hid32, ref_hid, **tight), float(jnp.max(jnp.abs(hid32 - ref_hid)))
    assert jnp.allclose(attn32, ref_attn, **tight), float(jnp.max(jnp.abs(attn32 - ref_attn)))

    print("KERNEL_OK")
</pallas_src>

<mosaic_0001>
module attributes {stable_mosaic.version = 11 : i64} {
  func.func @_vocab_proj_kernel(%arg0: i32, %arg1: memref<8x128xf32, #tpu.memory_space<vmem>>, %arg2: memref<128x128xbf16, #tpu.memory_space<vmem>>, %arg3: memref<1x128xf32, #tpu.memory_space<vmem>>, %arg4: memref<8x128xf32, #tpu.memory_space<vmem>>) attributes {dimension_semantics = [#tpu.dimension_semantics<parallel>], iteration_bounds = array<i64: 1>, scalar_prefetch = 0 : i64, scratch_operands = 0 : i64, tpu.core_type = #tpu.core_type<tc>, window_params = [{pipeline_mode = #tpu.pipeline_mode<synchronous>, transform_indices = @transform_0, window_bounds = array<i64: 8, 128>}, {transform_indices = @transform_1, window_bounds = array<i64: 128, 128>}, {transform_indices = @transform_2, window_bounds = array<i64: 1, 128>}, {transform_indices = @transform_3, window_bounds = array<i64: 8, 128>}]} {
    %c0 = arith.constant 0 : index
    %c0_0 = arith.constant 0 : index
    %0 = vector.load %arg1[%c0, %c0_0] : memref<8x128xf32, #tpu.memory_space<vmem>>, vector<8x128xf32>
    %1 = arith.truncf %0 : vector<8x128xf32> to vector<8x128xbf16>
    %c0_1 = arith.constant 0 : index
    %c0_2 = arith.constant 0 : index
    %2 = vector.load %arg2[%c0_1, %c0_2] : memref<128x128xbf16, #tpu.memory_space<vmem>>, vector<128x128xbf16>
    %cst = arith.constant dense<0.000000e+00> : vector<8x128xf32>
    %3 = tpu.matmul %1, %2, %cst {dimension_numbers = #tpu.dot_dimension_numbers<[1], [0], [0], [1], [0, 0, 1, 1], [], []>} : vector<8x128xbf16>, vector<128x128xbf16>, vector<8x128xf32> -> vector<8x128xf32>
    %c0_3 = arith.constant 0 : index
    %c0_4 = arith.constant 0 : index
    %4 = vector.load %arg3[%c0_3, %c0_4] : memref<1x128xf32, #tpu.memory_space<vmem>>, vector<1x128xf32>
    %5 = vector.broadcast %4 : vector<1x128xf32> to vector<8x128xf32>
    %6 = arith.addf %3, %5 : vector<8x128xf32>
    %c0_5 = arith.constant 0 : index
    %c0_6 = arith.constant 0 : index
    %7 = vector.load %arg4[%c0_5, %c0_6] : memref<8x128xf32, #tpu.memory_space<vmem>>, vector<8x128xf32>
    tpu.vector_store %arg4[%c0_5, %c0_6], %6 {strides = array<i32>} : memref<8x128xf32, #tpu.memory_space<vmem>>, vector<8x128xf32>,
    return
  }
  func.func @transform_0(%arg0: i32) -> (i32, i32) {
    %c0_i32 = arith.constant 0 : i32
    %c0_i32_0 = arith.constant 0 : i32
    %c0_i32_1 = arith.constant 0 : i32
    return %c0_i32, %c0_i32_0 : i32, i32
  }
  func.func @transform_1(%arg0: i32) -> (i32, i32) {
    %c0_i32 = arith.constant 0 : i32
    %c0_i32_0 = arith.constant 0 : i32
    return %c0_i32, %arg0 : i32, i32
  }
  func.func @transform_2(%arg0: i32) -> (i32, i32) {
    %c0_i32 = arith.constant 0 : i32
    %c0_i32_0 = arith.constant 0 : i32
    return %c0_i32, %arg0 : i32, i32
  }
  func.func @transform_3(%arg0: i32) -> (i32, i32) {
    %c0_i32 = arith.constant 0 : i32
    %c0_i32_0 = arith.constant 0 : i32
    return %c0_i32, %arg0 : i32, i32
  }
}

module attributes {stable_mosaic.version = 11 : i64} {
  func.func @_gru_attn_kernel(%arg0: memref<8x128xf32, #tpu.memory_space<vmem>>, %arg1: memref<8x128xf32, #tpu.memory_space<vmem>>, %arg2: memref<8x128x128xf32, #tpu.memory_space<vmem>>, %arg3: memref<8x128x128xf32, #tpu.memory_space<vmem>>, %arg4: memref<1x1x128xf32, #tpu.memory_space<vmem>>, %arg5: memref<128x384xf32, #tpu.memory_space<vmem>>, %arg6: memref<128x384xf32, #tpu.memory_space<vmem>>, %arg7: memref<1x384xf32, #tpu.memory_space<vmem>>, %arg8: memref<1x384xf32, #tpu.memory_space<vmem>>, %arg9: memref<128x128xf32, #tpu.memory_space<vmem>>, %arg10: memref<128x128xf32, #tpu.memory_space<vmem>>, %arg11: memref<1x128xf32, #tpu.memory_space<vmem>>, %arg12: memref<8x128xf32, #tpu.memory_space<vmem>>, %arg13: memref<8x128xf32, #tpu.memory_space<vmem>>, %arg14: memref<8x128xf32, #tpu.memory_space<vmem>>, %arg15: memref<8x128xf32, #tpu.memory_space<vmem>>) attributes {dimension_semantics = [], scalar_prefetch = 0 : i64, scratch_operands = 0 : i64, tpu.core_type = #tpu.core_type<tc>} {
    %c0 = arith.constant 0 : index
    %c0_0 = arith.constant 0 : index
    %0 = vector.load %arg0[%c0, %c0_0] : memref<8x128xf32, #tpu.memory_space<vmem>>, vector<8x128xf32>
    %c0_1 = arith.constant 0 : index
    %c0_2 = arith.constant 0 : index
    %1 = vector.load %arg1[%c0_1, %c0_2] : memref<8x128xf32, #tpu.memory_space<vmem>>, vector<8x128xf32>
    %c0_3 = arith.constant 0 : index
    %c0_4 = arith.constant 0 : index
    %2 = vector.load %arg5[%c0_3, %c0_4] : memref<128x384xf32, #tpu.memory_space<vmem>>, vector<128x384xf32>
    %cst = arith.constant dense<0.000000e+00> : vector<8x384xf32>
    %3 = tpu.matmul %0, %2, %cst {dimension_numbers = #tpu.dot_dimension_numbers<[1], [0], [0], [1], [0, 0, 1, 1], [], []>} : vector<8x128xf32>, vector<128x384xf32>, vector<8x384xf32> -> vector<8x384xf32>
    %c0_5 = arith.constant 0 : index
    %c0_6 = arith.constant 0 : index
    %4 = vector.load %arg7[%c0_5, %c0_6] : memref<1x384xf32, #tpu.memory_space<vmem>>, vector<1x384xf32>
    %5 = vector.broadcast %4 : vector<1x384xf32> to vector<8x384xf32>
    %6 = arith.addf %3, %5 : vector<8x384xf32>
    %c0_7 = arith.constant 0 : index
    %c0_8 = arith.constant 0 : index
    %7 = vector.load %arg6[%c0_7, %c0_8] : memref<128x384xf32, #tpu.memory_space<vmem>>, vector<128x384xf32>
    %cst_9 = arith.constant dense<0.000000e+00> : vector<8x384xf32>
    %8 = tpu.matmul %1, %7, %cst_9 {dimension_numbers = #tpu.dot_dimension_numbers<[1], [0], [0], [1], [0, 0, 1, 1], [], []>} : vector<8x128xf32>, vector<128x384xf32>, vector<8x384xf32> -> vector<8x384xf32>
    %c0_10 = arith.constant 0 : index
    %c0_11 = arith.constant 0 : index
    %9 = vector.load %arg8[%c0_10, %c0_11] : memref<1x384xf32, #tpu.memory_space<vmem>>, vector<1x384xf32>
    %10 = vector.broadcast %9 : vector<1x384xf32> to vector<8x384xf32>
    %11 = arith.addf %8, %10 : vector<8x384xf32>
    %12 = vector.extract_strided_slice %6 {offsets = [0, 0], sizes = [8, 128], strides = [1, 1]} : vector<8x384xf32> to vector<8x128xf32>
    %13 = vector.extract_strided_slice %11 {offsets = [0, 0], sizes = [8, 128], strides = [1, 1]} : vector<8x384xf32> to vector<8x128xf32>
    %14 = arith.addf %12, %13 : vector<8x128xf32>
    %15 = arith.negf %14 : vector<8x128xf32>
    %16 = math.exp %15 : vector<8x128xf32>
    %cst_12 = arith.constant 1.000000e+00 : f32
    %17 = vector.broadcast %cst_12 : f32 to vector<8x128xf32>
    %18 = arith.addf %17, %16 : vector<8x128xf32>
    %19 = arith.divf %17, %18 : vector<8x128xf32>
    %20 = vector.extract_strided_slice %6 {offsets = [0, 128], sizes = [8, 128], strides = [1, 1]} : vector<8x384xf32> to vector<8x128xf32>
    %21 = vector.extract_strided_slice %11 {offsets = [0, 128], sizes = [8, 128], strides = [1, 1]} : vector<8x384xf32> to vector<8x128xf32>
    %22 = arith.addf %20, %21 : vector<8x128xf32>
    %23 = arith.negf %22 : vector<8x128xf32>
    %24 = math.exp %23 : vector<8x128xf32>
    %cst_13 = arith.constant 1.000000e+00 : f32
    %25 = vector.broadcast %cst_13 : f32 to vector<8x128xf32>
    %26 = arith.addf %25, %24 : vector<8x128xf32>
    %27 = arith.divf %25, %26 : vector<8x128xf32>
    %28 = vector.extract_strided_slice %6 {offsets = [0, 256], sizes = [8, 128], strides = [1, 1]} : vector<8x384xf32> to vector<8x128xf32>
    %29 = vector.extract_strided_slice %11 {offsets = [0, 256], sizes = [8, 128], strides = [1, 1]} : vector<8x384xf32> to vector<8x128xf32>
    %30 = arith.mulf %19, %29 : vector<8x128xf32>
    %31 = arith.addf %28, %30 : vector<8x128xf32>
    %32 = math.tanh %31 : vector<8x128xf32>
    %cst_14 = arith.constant 1.000000e+00 : f32
    %33 = vector.broadcast %cst_14 : f32 to vector<8x128xf32>
    %34 = arith.subf %33, %27 : vector<8x128xf32>
    %35 = arith.mulf %34, %32 : vector<8x128xf32>
    %36 = arith.mulf %27, %1 : vector<8x128xf32>
    %37 = arith.addf %35, %36 : vector<8x128xf32>
    %38 = vector.shape_cast %37 : vector<8x128xf32> to vector<8x1x128xf32>
    %c0_15 = arith.constant 0 : index
    %c0_16 = arith.constant 0 : index
    %c0_17 = arith.constant 0 : index
    %39 = vector.load %arg2[%c0_15, %c0_16, %c0_17] : memref<8x128x128xf32, #tpu.memory_space<vmem>>, vector<8x128x128xf32>
    "tpu.trace_start"() <{level = 10 : i32, message = "bqh,bhs->bqs"}> : () -> ()
    %cst_18 = arith.constant dense<0.000000e+00> : vector<8x1x128xf32>
    %40 = tpu.matmul %38, %39, %cst_18 {dimension_numbers = #tpu.dot_dimension_numbers<[2], [1], [1], [2], [0, 0, 0, 1, 1, 2], [0], [0]>} : vector<8x1x128xf32>, vector<8x128x128xf32>, vector<8x1x128xf32> -> vector<8x1x128xf32>
    "tpu.trace_stop"() : () -> ()
    %c0_19 = arith.constant 0 : index
    %c0_20 = arith.constant 0 : index
    %c0_21 = arith.constant 0 : index
    %41 = vector.load %arg4[%c0_19, %c0_20, %c0_21] : memref<1x1x128xf32, #tpu.memory_space<vmem>>, vector<1x1x128xf32>
    %42 = vector.broadcast %41 : vector<1x1x128xf32> to vector<8x1x128xf32>
    %43 = arith.addf %40, %42 : vector<8x1x128xf32>
    %cst_22 = arith.constant dense<0xFF800000> : vector<8x1xf32>
    %44 = vector.multi_reduction <maximumf>, %43, %cst_22 [2] : vector<8x1x128xf32> to vector<8x1xf32>
    %45 = vector.shape_cast %44 : vector<8x1xf32> to vector<8x1x1xf32>
    %46 = vector.broadcast %45 : vector<8x1x1xf32> to vector<8x1x128xf32>
    %47 = arith.subf %43, %46 : vector<8x1x128xf32>
    %48 = math.exp %47 : vector<8x1x128xf32>
    %cst_23 = arith.constant dense<0.000000e+00> : vector<8x1xf32>
    %49 = vector.multi_reduction <add>, %48, %cst_23 [2] : vector<8x1x128xf32> to vector<8x1xf32>
    %50 = vector.shape_cast %49 : vector<8x1xf32> to vector<8x1x1xf32>
    %51 = tpu.reciprocal %50 {approx = true} : vector<8x1x1xf32> -> vector<8x1x1xf32>
    %52 = arith.mulf %50, %51 : vector<8x1x1xf32>
    %cst_24 = arith.constant 2.000000e+00 : f32
    %53 = vector.broadcast %cst_24 : f32 to vector<8x1x1xf32>
    %54 = arith.subf %53, %52 : vector<8x1x1xf32>
    %55 = arith.mulf %51, %54 : vector<8x1x1xf32>
    %56 = vector.broadcast %55 : vector<8x1x1xf32> to vector<8x1x128xf32>
    %57 = arith.mulf %48, %56 : vector<8x1x128xf32>
    %c0_25 = arith.constant 0 : index
    %c0_26 = arith.constant 0 : index
    %c0_27 = arith.constant 0 : index
    %58 = vector.load %arg3[%c0_25, %c0_26, %c0_27] : memref<8x128x128xf32, #tpu.memory_space<vmem>>, vector<8x128x128xf32>
    "tpu.trace_start"() <{level = 10 : i32, message = "bqs,bsh->bqh"}> : () -> ()
    %cst_28 = arith.constant dense<0.000000e+00> : vector<8x1x128xf32>
    %59 = tpu.matmul %57, %58, %cst_28 {dimension_numbers = #tpu.dot_dimension_numbers<[2], [1], [1], [2], [0, 0, 0, 1, 1, 2], [0], [0]>} : vector<8x1x128xf32>, vector<8x128x128xf32>, vector<8x1x128xf32> -> vector<8x1x128xf32>
    "tpu.trace_stop"() : () -> ()
    %60 = vector.shape_cast %59 : vector<8x1x128xf32> to vector<8x128xf32>
    %c0_29 = arith.constant 0 : index
    %c0_30 = arith.constant 0 : index
    %61 = vector.load %arg9[%c0_29, %c0_30] : memref<128x128xf32, #tpu.memory_space<vmem>>, vector<128x128xf32>
    %cst_31 = arith.constant dense<0.000000e+00> : vector<8x128xf32>
    %62 = tpu.matmul %37, %61, %cst_31 {dimension_numbers = #tpu.dot_dimension_numbers<[1], [0], [0], [1], [0, 0, 1, 1], [], []>} : vector<8x128xf32>, vector<128x128xf32>, vector<8x128xf32> -> vector<8x128xf32>
    %c0_32 = arith.constant 0 : index
    %c0_33 = arith.constant 0 : index
    %63 = vector.load %arg10[%c0_32, %c0_33] : memref<128x128xf32, #tpu.memory_space<vmem>>, vector<128x128xf32>
    %cst_34 = arith.constant dense<0.000000e+00> : vector<8x128xf32>
    %64 = tpu.matmul %60, %63, %cst_34 {dimension_numbers = #tpu.dot_dimension_numbers<[1], [0], [0], [1], [0, 0, 1, 1], [], []>} : vector<8x128xf32>, vector<128x128xf32>, vector<8x128xf32> -> vector<8x128xf32>
    %65 = arith.addf %62, %64 : vector<8x128xf32>
    %c0_35 = arith.constant 0 : index
    %c0_36 = arith.constant 0 : index
    %66 = vector.load %arg11[%c0_35, %c0_36] : memref<1x128xf32, #tpu.memory_space<vmem>>, vector<1x128xf32>
    %67 = vector.broadcast %66 : vector<1x128xf32> to vector<8x128xf32>
    %68 = arith.addf %65, %67 : vector<8x128xf32>
    %69 = math.tanh %68 : vector<8x128xf32>
    %c0_37 = arith.constant 0 : index
    %c0_38 = arith.constant 0 : index
    %70 = vector.load %arg12[%c0_37, %c0_38] : memref<8x128xf32, #tpu.memory_space<vmem>>, vector<8x128xf32>
    tpu.vector_store %arg12[%c0_37, %c0_38], %69 {strides = array<i32>} : memref<8x128xf32, #tpu.memory_space<vmem>>, vector<8x128xf32>,
    %c0_39 = arith.constant 0 : index
    %c0_40 = arith.constant 0 : index
    %71 = vector.load %arg13[%c0_39, %c0_40] : memref<8x128xf32, #tpu.memory_space<vmem>>, vector<8x128xf32>
    tpu.vector_store %arg13[%c0_39, %c0_40], %60 {strides = array<i32>} : memref<8x128xf32, #tpu.memory_space<vmem>>, vector<8x128xf32>,
    %c0_41 = arith.constant 0 : index
    %c0_42 = arith.constant 0 : index
    %72 = vector.load %arg14[%c0_41, %c0_42] : memref<8x128xf32, #tpu.memory_space<vmem>>, vector<8x128xf32>
    tpu.vector_store %arg14[%c0_41, %c0_42], %37 {strides = array<i32>} : memref<8x128xf32, #tpu.memory_space<vmem>>, vector<8x128xf32>,
    %73 = vector.shape_cast %57 : vector<8x1x128xf32> to vector<8x128xf32>
    %c0_43 = arith.constant 0 : index
    %c0_44 = arith.constant 0 : index
    %74 = vector.load %arg15[%c0_43, %c0_44] : memref<8x128xf32, #tpu.memory_space<vmem>>, vector<8x128xf32>
    tpu.vector_store %arg15[%c0_43, %c0_44], %73 {strides = array<i32>} : memref<8x128xf32, #tpu.memory_space<vmem>>, vector<8x128xf32>,
    return
  }
}

</mosaic_0001>

<bundles_post_ra>
// kernel: _forward_jit.3
= control target key start
LH: loop header
LB: loop body
LE: loop exit
PB: predicated region body
PF: predicated region fallthrough
CT: control target
= control target key end

     0   :  { %v181_v0 = vmov 0.0   ;;  %vm182_vm0 = vmmov 0   ;;  %s236_s1 = inlined_call_operand.vmem [shape: bf16[128,128], index: 1, kind: input, shape index: {}]   ;;  %s237_s0 = inlined_call_operand.vmem [shape: f32[8,128], index: 0, kind: input, shape index: {}]   ;;  %s238_s2 = inlined_call_operand.vmem [shape: f32[1,128], index: 2, kind: input, shape index: {}]   ;;  %s239_s3 = inlined_call_operand.vmem [shape: f32[8,128], index: 3, kind: output, shape index: {}]  }
   0x1   :  { %151 = vmatprep.subr.bf16.mxu0 %v181_v0  ;;  %v173_v1 = vld [vmem:[%s236_s1 + $0x38] sm:$0xff]   ;;  %167 = vmatprep.mubr.msk.bf16.mxu0 %vm182_vm0, %v181_v0  ;;  %v174_v2 = vld [vmem:[%s236_s1 + $0x30] sm:$0xff]   ;;  %v175_v3 = vld [vmem:[%s236_s1 + $0x28] sm:$0xff]  }
   0x2   :  { %152 = vmatpush3.bf16.msra.mxu0 %v173_v1  ;;  %v176_v4 = vld [vmem:[%s236_s1 + $0x20] sm:$0xff]   ;;  %v177_v5 = vld [vmem:[%s236_s1 + $0x18] sm:$0xff]   ;;  %v178_v6 = vld [vmem:[%s236_s1 + $0x10] sm:$0xff]  }
   0x3   :  { %153 = vmatprep.subr.bf16.mxu0 %v181_v0  ;;  %v179_v7 = vld [vmem:[%s236_s1 + $0x8] sm:$0xff]   ;;  %v180_v8 = vld [vmem:[%s236_s1] sm:$0xff]  }
   0x4   :  { %v15_v9 = vld [vmem:[%s237_s0] sm:$0xff] }
   0x5   :  { %v16_v10 = vpack.c.bf16 %v15_v9, %v15_v9  ;;  %v133_v11 = vld [vmem:[%s238_s2] ss:$0 sm:$0xff] }
   0x6   :  { %154 = vmatpush3.bf16.msra.mxu0 %v174_v2 }
   0x7   :  { %155 = vmatprep.subr.bf16.mxu0 %v181_v0 }
   0xa   :  { %156 = vmatpush3.bf16.msra.mxu0 %v175_v3 }
   0xb   :  { %157 = vmatprep.subr.bf16.mxu0 %v181_v0 }
   0xe   :  { %158 = vmatpush3.bf16.msra.mxu0 %v176_v4 }
   0xf   :  { %159 = vmatprep.subr.bf16.mxu0 %v181_v0 }
  0x12   :  { %160 = vmatpush3.bf16.msra.mxu0 %v177_v5 }
  0x13   :  { %161 = vmatprep.subr.bf16.mxu0 %v181_v0 }
  0x16   :  { %162 = vmatpush3.bf16.msra.mxu0 %v178_v6 }
  0x17   :  { %163 = vmatprep.subr.bf16.mxu0 %v181_v0 }
  0x1a   :  { %164 = vmatpush3.bf16.msra.mxu0 %v179_v7 }
  0x1b   :  { %165 = vmatprep.subr.bf16.mxu0 %v181_v0 }
  0x1e   :  { %166 = vmatpush3.bf16.msra.mxu0 %v180_v8 }
  0x21   :  { %168 = vmatmul.mubr.bf16.vlgmr.msra.gmra.mxu0 %v16_v10 }
  0xe1   :  { %v122_v12 = vpop.f32.mrf.mxu0 }
  0xe2   :  { %v123_v13 = vadd.f32 %v133_v11, %v122_v12 }
  0xe3   :  { %v169_v14 = vpop.f32.mrf.mxu0 }
  0xe4   :  { %128 = vst [vmem:[%s239_s3] sm:$0xff] %v123_v13 }
  0xe5   :  { %v125_v15 = vpop.f32.mrf.mxu0 }
  0xe7   :  { %v170_v16 = vpop.f32.mrf.mxu0 }

// kernel: _forward_jit.2
= control target key start
LH: loop header
LB: loop body
LE: loop exit
PB: predicated region body
PF: predicated region fallthrough
CT: control target
= control target key end

     0   :  { %21 = vsyncpa [#allocation3], 0  ;;  %s4259_s0 = inlined_call_operand.vmem [shape: f32[8,128], index: 0, kind: input, shape index: {}]   ;;  %s4260_s1 = inlined_call_operand.vmem [shape: f32[8,128], index: 1, kind: input, shape index: {}, may-alias: {1,14}]   ;;  %s4261_s2 = inlined_call_operand.hbm [shape: f32[8,128,128], index: 2, kind: input, shape index: {}]   ;;  %s4262_s3 = inlined_call_operand.hbm [shape: f32[8,128,128], index: 3, kind: input, shape index: {}]   ;;  %s4263_s4 = inlined_call_operand.vmem [shape: f32[1,1,128], index: 4, kind: input, shape index: {}]   ;;  %s4264_s5 = inlined_call_operand.hbm [shape: f32[128,384], index: 5, kind: input, shape index: {}]   ;;  %s4265_s6 = inlined_call_operand.hbm [shape: f32[128,384], index: 6, kind: input, shape index: {}]   ;;  %s4266_s7 = inlined_call_operand.vmem [shape: f32[1,384], index: 7, kind: input, shape index: {}]   ;;  %s4267_s8 = inlined_call_operand.vmem [shape: f32[1,384], index: 8, kind: input, shape index: {}]   ;;  %s4268_s9 = inlined_call_operand.hbm [shape: f32[128,128], index: 9, kind: input, shape index: {}]   ;;  %s4269_s10 = inlined_call_operand.hbm [shape: f32[128,128], index: 10, kind: input, shape index: {}]   ;;  %s4270_s11 = inlined_call_operand.vmem [shape: f32[1,128], index: 11, kind: input, shape index: {}]   ;;  %s4271_s12 = inlined_call_operand.vmem [shape: f32[8,128], index: 12, kind: output, shape index: {0}]   ;;  %s4272_s13 = inlined_call_operand.vmem [shape: f32[8,128], index: 13, kind: output, shape index: {1}]   ;;  %s4273_s14 = inlined_call_operand.vmem [shape: f32[8,128], index: 14, kind: output, shape index: {2}, may-alias: {1,14}]   ;;  %s4274_s15 = inlined_call_operand.vmem [shape: f32[8,128], index: 15, kind: output, shape index: {3}]  }
   0x1   :  { %22 = vsyncpa [#allocation5], 0 }
   0x2   :  { %23 = vsyncpa [#allocation8], 0 }
   0x3   :  { %24 = vsyncpa [#allocation11], 0  ;;  %s3597_s18 = smov [#allocation4]  }
   0x4   :  { %s46_s19 = sshll.u32 %s3597_s18, 4  ;;  %s47_s19 = int_to_ptr.vmem [resolvable:$true] %s46_s19 }
   0x5   :  { %s3477_s20 = scalar_lea.vmem %s47_s19, 16384  ;;  %p3482_p1 = scmp.lt.s32.totalorder %s47_s19, %s47_s19 }
   0x6   :  { %p3478_p0 = scmp.ne.s32.totalorder %s47_s19, %s3477_s20  ;;  %p3483_p2 = scmp.lt.s32.totalorder %s3477_s20, %s3477_s20 }
   0x8   :  { %p3484_p3 = por %p3483_p2, %p3482_p1 }
   0xa   :  { %p3485_p4 = pnand %p3484_p3, %p3478_p0 }
   0xc   :  { %3488 = shalt.err (!%p3485_p4)
}
   0xd   :  { %s3598_s21 = smov 128   ;;  %s3599_s22 = smov 8  }
   0xe   :  { %52 = dma.hbm_to_vmem [thread:$0]  %s4262_s3, 16384, %s47_s19, [#allocation5], %s3598_s21, %s3598_s21, %s3599_s22  }
   0xf   :  { %s3600_s25 = smov [#allocation7]   ;;  %s3601_s27 = smov [#allocation2]  }
  0x10   :  { %s72_s26 = sshll.u32 %s3600_s25, 4  ;;  %s34_s28 = sshll.u32 %s3601_s27, 4  ;;  %s73_s26 = int_to_ptr.vmem [resolvable:$true] %s72_s26  ;;  %s35_s28 = int_to_ptr.vmem [resolvable:$true] %s34_s28 }
  0x11   :  { %s3497_s29 = scalar_lea.vmem %s73_s26, 6144  ;;  %p3502_p6 = scmp.lt.s32.totalorder %s73_s26, %s73_s26 }
  0x12   :  { %p3498_p5 = scmp.ne.s32.totalorder %s73_s26, %s3497_s29  ;;  %p3503_p7 = scmp.lt.s32.totalorder %s3497_s29, %s3497_s29 }
  0x14   :  { %p3504_p8 = por %p3503_p7, %p3502_p6 }
  0x16   :  { %p3505_p9 = pnand %p3504_p8, %p3498_p5 }
  0x18   :  { %3508 = shalt.err (!%p3505_p9)
}
  0x19   :  { %s3602_s30 = smov 384   ;;  %s3603_s16 = smov 24  }
  0x1a   :  { %78 = dma.hbm_to_vmem [thread:$0]  %s4265_s6, 6144, %s73_s26, [#allocation8], %s3602_s30, %s3602_s30, %s3603_s16  }
  0x1b   :  { %s3517_s3 = scalar_lea.vmem %s35_s28, 16384  ;;  %p3522_p11 = scmp.lt.s32.totalorder %s35_s28, %s35_s28 }
  0x1c   :  { %p3518_p10 = scmp.ne.s32.totalorder %s35_s28, %s3517_s3  ;;  %p3523_p12 = scmp.lt.s32.totalorder %s3517_s3, %s3517_s3 }
  0x1e   :  { %p3524_p13 = por %p3523_p12, %p3522_p11 }
  0x20   :  { %p3525_p0 = pnand %p3524_p13, %p3518_p10 }
  0x22   :  { %3528 = shalt.err (!%p3525_p0)
}
  0x23   :  { %40 = dma.hbm_to_vmem [thread:$0]  %s4261_s2, 16384, %s35_s28, [#allocation3], %s3598_s21, %s3598_s21, %s3599_s22  }
  0x24   :  { %s3604_s23 = smov [#allocation6]   ;;  %s3605_s25 = smov [#allocation9]  }
  0x25   :  { %s60_s24 = sshll.u32 %s3604_s23, 4  ;;  %s88_s6 = sshll.u32 %s3605_s25, 4  ;;  %s61_s24 = int_to_ptr.vmem [resolvable:$true] %s60_s24  ;;  %s89_s6 = int_to_ptr.vmem [resolvable:$true] %s88_s6 }
  0x26   :  { %s3537_s26 = scalar_lea.vmem %s61_s24, 6144  ;;  %p3542_p2 = scmp.lt.s32.totalorder %s61_s24, %s61_s24 }
  0x27   :  { %p3538_p1 = scmp.ne.s32.totalorder %s61_s24, %s3537_s26  ;;  %p3543_p3 = scmp.lt.s32.totalorder %s3537_s26, %s3537_s26 }
  0x29   :  { %p3544_p4 = por %p3543_p3, %p3542_p2 }
  0x2b   :  { %p3545_p5 = pnand %p3544_p4, %p3538_p1 }
  0x2d   :  { %3548 = shalt.err (!%p3545_p5)
}
  0x2e   :  { %66 = dma.hbm_to_vmem [thread:$0]  %s4264_s5, 6144, %s61_s24, [#allocation5], %s3602_s30, %s3602_s30, %s3603_s16  }
  0x2f   :  { %s3557_s17 = scalar_lea.vmem %s89_s6, 2048  ;;  %p3562_p7 = scmp.lt.s32.totalorder %s89_s6, %s89_s6 }
  0x30   :  { %p3558_p6 = scmp.ne.s32.totalorder %s89_s6, %s3557_s17  ;;  %p3563_p8 = scmp.lt.s32.totalorder %s3557_s17, %s3557_s17 }
  0x32   :  { %p3564_p9 = por %p3563_p8, %p3562_p7 }
  0x34   :  { %p3565_p10 = pnand %p3564_p9, %p3558_p6 }
  0x36   :  { %3568 = shalt.err (!%p3565_p10)
}
  0x37   :  { %94 = dma.hbm_to_vmem [thread:$0]  %s4268_s9, 2048, %s89_s6, [#allocation8], %s3598_s21, %s3598_s21, %s3599_s22  }
  0x38   :  { %s3606_s18 = smov [#allocation10]  }
  0x39   :  { %s100_s3 = sshll.u32 %s3606_s18, 4  ;;  %s101_s3 = int_to_ptr.vmem [resolvable:$true] %s100_s3 }
  0x3a   :  { %s3577_s19 = scalar_lea.vmem %s101_s3, 2048  ;;  %p3582_p12 = scmp.lt.s32.totalorder %s101_s3, %s101_s3 }
  0x3b   :  { %p3578_p11 = scmp.ne.s32.totalorder %s101_s3, %s3577_s19  ;;  %p3583_p13 = scmp.lt.s32.totalorder %s3577_s19, %s3577_s19 }
  0x3d   :  { %p3584_p0 = por %p3583_p13, %p3582_p12 }
  0x3f   :  { %p3585_p1 = pnand %p3584_p0, %p3578_p11 }
  0x41   :  { %3588 = shalt.err (!%p3585_p1)
}
  0x42   :  { %106 = dma.hbm_to_vmem [thread:$0]  %s4269_s10, 2048, %s101_s3, [#allocation11], %s3598_s21, %s3598_s21, %s3599_s22  }
  0x43   :  { %3589 = dma.done.wait [#allocation3], 16384  }
  0x44   :  { %3590 = vsyncadd [#allocation3], 4294950912 }
  0x45   :  { %3591 = dma.done.wait [#allocation5], 22528  }
  0x46   :  { %3592 = vsyncadd [#allocation5], 4294944768 }
  0x47   :  { %3593 = dma.done.wait [#allocation8], 8192  }
  0x48   :  { %3594 = vsyncadd [#allocation8], 4294959104 }
  0x49   :  { %3595 = dma.done.wait [#allocation11], 2048  }
  0x4a   :  { %3596 = vsyncadd [#allocation11], 4294965248  ;;  %v3607_v0 = vmov 0.0   ;;  %vm3608_vm0 = vmmov 0   ;;  %v175_v1 = vld [vmem:[#allocation6 + $0x170] sm:$0xff]  ;;  %v174_v2 = vld [vmem:[#allocation6 + $0x168] sm:$0xff] }
  0x4b   :  { %258 = vmatprep.mubr.f32.mxu0 %v3607_v0  ;;  %2711 = vmatprep.subr.mxu1 %v3607_v0  ;;  %v172_v3 = vld [vmem:[#allocation6 + $0x158] sm:$0xff]  ;;  %v171_v4 = vld [vmem:[#allocation6 + $0x150] sm:$0xff]  ;;  %v169_v5 = vld [vmem:[#allocation6 + $0x140] sm:$0xff]  ;;  %vm1309_vm1 = vcmask 1040384   ;;  %vm2151_vm2 = vcmask 1041409   ;;  %vm2154_vm3 = vcmask 1042434  }
  0x4c   :  { %2743 = vmatprep.mubr.msk.f32.mxu1 %vm3608_vm0, %v3607_v0  ;;  %194 = vmatprep.subr.mxu0 %v175_v1  ;;  %v168_v6 = vld [vmem:[#allocation6 + $0x138] sm:$0xff]  ;;  %v166_v7 = vld [vmem:[#allocation6 + $0x128] sm:$0xff]  ;;  %v165_v8 = vld [vmem:[#allocation6 + $0x120] sm:$0xff]  ;;  %vm2157_vm4 = vcmask 1043459   ;;  %vm2160_vm5 = vcmask 1044484   ;;  %vm2163_vm6 = vcmask 1045509  }
  0x4d   :  { %195 = vmatpush1.msra.mxu0 %v174_v2  ;;  %v163_v9 = vld [vmem:[#allocation6 + $0x110] sm:$0xff]  ;;  %v162_v10 = vld [vmem:[#allocation6 + $0x108] sm:$0xff]  ;;  %v160_v11 = vld [vmem:[#allocation6 + $0xf8] sm:$0xff]  ;;  %vm2166_vm7 = vcmask 1046534   ;;  %vm2169_vm8 = vcmask 1047559  }
  0x4e   :  { %196 = vmatprep.subr.mxu0 %v172_v3  ;;  %v159_v12 = vld [vmem:[#allocation6 + $0xf0] sm:$0xff]  ;;  %v157_v13 = vld [vmem:[#allocation6 + $0xe0] sm:$0xff]  ;;  %v156_v14 = vld [vmem:[#allocation6 + $0xd8] sm:$0xff] }
  0x4f   :  { %197 = vmatpush1.msra.mxu0 %v171_v4  ;;  %v176_v15 = vld [vmem:[#allocation6 + $0x178] sm:$0xff]  ;;  %v154_v16 = vld [vmem:[#allocation6 + $0xc8] sm:$0xff]  ;;  %v173_v17 = vld [vmem:[#allocation6 + $0x160] sm:$0xff] }
  0x50   :  { %198 = vmatprep.subr.mxu0 %v169_v5  ;;  %2712 = vmatpush3.msra.mxu1 %v176_v15  ;;  %v153_v18 = vld [vmem:[#allocation6 + $0xc0] sm:$0xff]  ;;  %v170_v19 = vld [vmem:[#allocation6 + $0x148] sm:$0xff]  ;;  %v151_v20 = vld [vmem:[#allocation6 + $0xb0] sm:$0xff] }
  0x51   :  { %199 = vmatpush1.msra.mxu0 %v168_v6  ;;  %2713 = vmatprep.subr.mxu1 %v3607_v0  ;;  %v150_v21 = vld [vmem:[#allocation6 + $0xa8] sm:$0xff]  ;;  %v167_v22 = vld [vmem:[#allocation6 + $0x130] sm:$0xff]  ;;  %v148_v23 = vld [vmem:[#allocation6 + $0x98] sm:$0xff] }
  0x52   :  { %200 = vmatprep.subr.mxu0 %v166_v7  ;;  %2714 = vmatpush3.msra.mxu1 %v173_v17  ;;  %v147_v24 = vld [vmem:[#allocation6 + $0x90] sm:$0xff]  ;;  %v164_v25 = vld [vmem:[#allocation6 + $0x118] sm:$0xff]  ;;  %v145_v26 = vld [vmem:[#allocation6 + $0x80] sm:$0xff] }
  0x53   :  { %201 = vmatpush1.msra.mxu0 %v165_v8  ;;  %2715 = vmatprep.subr.mxu1 %v3607_v0  ;;  %v144_v27 = vld [vmem:[#allocation6 + $0x78] sm:$0xff]  ;;  %v161_v28 = vld [vmem:[#allocation6 + $0x100] sm:$0xff]  ;;  %v142_v29 = vld [vmem:[#allocation6 + $0x68] sm:$0xff] }
  0x54   :  { %202 = vmatprep.subr.mxu0 %v163_v9  ;;  %2716 = vmatpush3.msra.mxu1 %v170_v19  ;;  %v141_v30 = vld [vmem:[#allocation6 + $0x60] sm:$0xff]  ;;  %v158_v31 = vld [vmem:[#allocation6 + $0xe8] sm:$0xff]  ;;  %v139_v32 = vld [vmem:[#allocation6 + $0x50] sm:$0xff] }
  0x55   :  { %203 = vmatpush1.msra.mxu0 %v162_v10  ;;  %2717 = vmatprep.subr.mxu1 %v3607_v0  ;;  %v138_v33 = vld [vmem:[#allocation6 + $0x48] sm:$0xff]  ;;  %v155_v34 = vld [vmem:[#allocation6 + $0xd0] sm:$0xff]  ;;  %v136_v35 = vld [vmem:[#allocation6 + $0x38] sm:$0xff] }
  0x56   :  { %204 = vmatprep.subr.mxu0 %v160_v11  ;;  %2718 = vmatpush3.msra.mxu1 %v167_v22  ;;  %v135_v36 = vld [vmem:[#allocation6 + $0x30] sm:$0xff]  ;;  %v152_v37 = vld [vmem:[#allocation6 + $0xb8] sm:$0xff]  ;;  %v133_v38 = vld [vmem:[#allocation6 + $0x20] sm:$0xff] }
  0x57   :  { %205 = vmatpush1.msra.mxu0 %v159_v12  ;;  %2719 = vmatprep.subr.mxu1 %v3607_v0  ;;  %v132_v39 = vld [vmem:[#allocation6 + $0x18] sm:$0xff]  ;;  %v149_v40 = vld [vmem:[#allocation6 + $0xa0] sm:$0xff]  ;;  %v130_v41 = vld [vmem:[#allocation6 + $0x8] sm:$0xff] }
  0x58   :  { %206 = vmatprep.subr.mxu0 %v157_v13  ;;  %2720 = vmatpush3.msra.mxu1 %v164_v25  ;;  %v129_v42 = vld [vmem:[#allocation6] sm:$0xff]  ;;  %v146_v43 = vld [vmem:[#allocation6 + $0x88] sm:$0xff]  ;;  %v381_v45 = vld [vmem:[#allocation7 + $0x170] sm:$0xff] }
  0x59   :  { %207 = vmatpush1.msra.mxu0 %v156_v14  ;;  %2721 = vmatprep.subr.mxu1 %v3607_v0  ;;  %v127_v44 = vld [vmem:[%s4259_s0] sm:$0xff]  ;;  %v380_v46 = vld [vmem:[#allocation7 + $0x168] sm:$0xff]  ;;  %v378_v47 = vld [vmem:[#allocation7 + $0x158] sm:$0xff] }
  0x5a   :  { %208 = vmatprep.subr.mxu0 %v154_v16  ;;  %2722 = vmatpush3.msra.mxu1 %v161_v28  ;;  %v143_v48 = vld [vmem:[#allocation6 + $0x70] sm:$0xff]  ;;  %v375_v50 = vld [vmem:[#allocation7 + $0x140] sm:$0xff]  ;;  %v140_v51 = vld [vmem:[#allocation6 + $0x58] sm:$0xff] }
  0x5b   :  { %209 = vmatpush1.msra.mxu0 %v153_v18  ;;  %2723 = vmatprep.subr.mxu1 %v3607_v0  ;;  %v377_v49 = vld [vmem:[#allocation7 + $0x150] sm:$0xff]  ;;  %v374_v52 = vld [vmem:[#allocation7 + $0x138] sm:$0xff]  ;;  %v372_v53 = vld [vmem:[#allocation7 + $0x128] sm:$0xff] }
  0x5c   :  { %210 = vmatprep.subr.mxu0 %v151_v20  ;;  %2724 = vmatpush3.msra.mxu1 %v158_v31  ;;  %v137_v54 = vld [vmem:[#allocation6 + $0x40] sm:$0xff]  ;;  %v369_v56 = vld [vmem:[#allocation7 + $0x110] sm:$0xff]  ;;  %v134_v57 = vld [vmem:[#allocation6 + $0x28] sm:$0xff] }
  0x5d   :  { %211 = vmatpush1.msra.mxu0 %v150_v21  ;;  %2725 = vmatprep.subr.mxu1 %v3607_v0  ;;  %v371_v55 = vld [vmem:[#allocation7 + $0x120] sm:$0xff]  ;;  %v368_v58 = vld [vmem:[#allocation7 + $0x108] sm:$0xff]  ;;  %v366_v59 = vld [vmem:[#allocation7 + $0xf8] sm:$0xff] }
  0x5e   :  { %212 = vmatprep.subr.mxu0 %v148_v23  ;;  %2726 = vmatpush3.msra.mxu1 %v155_v34  ;;  %v131_v60 = vld [vmem:[#allocation6 + $0x10] sm:$0xff]  ;;  %v363_v62 = vld [vmem:[#allocation7 + $0xe0] sm:$0xff]  ;;  %v362_v63 = vld [vmem:[#allocation7 + $0xd8] sm:$0xff] }
  0x5f   :  { %213 = vmatpush1.msra.mxu0 %v147_v24  ;;  %2727 = vmatprep.subr.mxu1 %v3607_v0  ;;  %v365_v61 = vld [vmem:[#allocation7 + $0xf0] sm:$0xff]  ;;  %v360_v1 = vld [vmem:[#allocation7 + $0xc8] sm:$0xff]  ;;  %v382_v2 = vld [vmem:[#allocation7 + $0x178] sm:$0xff] }
  0x60   :  { %214 = vmatprep.subr.mxu0 %v145_v26  ;;  %2728 = vmatpush3.msra.mxu1 %v152_v37  ;;  %v359_v3 = vld [vmem:[#allocation7 + $0xc0] sm:$0xff]  ;;  %v357_v4 = vld [vmem:[#allocation7 + $0xb0] sm:$0xff]  ;;  %v356_v6 = vld [vmem:[#allocation7 + $0xa8] sm:$0xff] }
  0x61   :  { %215 = vmatpush1.msra.mxu0 %v144_v27  ;;  %2729 = vmatprep.subr.mxu1 %v3607_v0  ;;  %v379_v5 = vld [vmem:[#allocation7 + $0x160] sm:$0xff]  ;;  %v354_v7 = vld [vmem:[#allocation7 + $0x98] sm:$0xff]  ;;  %v376_v8 = vld [vmem:[#allocation7 + $0x148] sm:$0xff] }
  0x62   :  { %216 = vmatprep.subr.mxu0 %v142_v29  ;;  %2730 = vmatpush3.msra.mxu1 %v149_v40  ;;  %v353_v9 = vld [vmem:[#allocation7 + $0x90] sm:$0xff]  ;;  %v351_v10 = vld [vmem:[#allocation7 + $0x80] sm:$0xff]  ;;  %v350_v12 = vld [vmem:[#allocation7 + $0x78] sm:$0xff] }
  0x63   :  { %217 = vmatpush1.msra.mxu0 %v141_v30  ;;  %2731 = vmatprep.subr.mxu1 %v3607_v0  ;;  %v373_v11 = vld [vmem:[#allocation7 + $0x130] sm:$0xff]  ;;  %v348_v13 = vld [vmem:[#allocation7 + $0x68] sm:$0xff]  ;;  %v370_v14 = vld [vmem:[#allocation7 + $0x118] sm:$0xff] }
  0x64   :  { %218 = vmatprep.subr.mxu0 %v139_v32  ;;  %2732 = vmatpush3.msra.mxu1 %v146_v43  ;;  %v347_v15 = vld [vmem:[#allocation7 + $0x60] sm:$0xff]  ;;  %v345_v16 = vld [vmem:[#allocation7 + $0x50] sm:$0xff]  ;;  %v344_v18 = vld [vmem:[#allocation7 + $0x48] sm:$0xff] }
  0x65   :  { %219 = vmatpush1.msra.mxu0 %v138_v33  ;;  %2733 = vmatprep.subr.mxu1 %v3607_v0  ;;  %v367_v17 = vld [vmem:[#allocation7 + $0x100] sm:$0xff]  ;;  %v342_v19 = vld [vmem:[#allocation7 + $0x38] sm:$0xff]  ;;  %v364_v20 = vld [vmem:[#allocation7 + $0xe8] sm:$0xff] }
  0x66   :  { %220 = vmatprep.subr.mxu0 %v136_v35  ;;  %2734 = vmatpush3.msra.mxu1 %v143_v48  ;;  %v341_v21 = vld [vmem:[#allocation7 + $0x30] sm:$0xff]  ;;  %v339_v22 = vld [vmem:[#allocation7 + $0x20] sm:$0xff]  ;;  %v338_v24 = vld [vmem:[#allocation7 + $0x18] sm:$0xff] }
  0x67   :  { %221 = vmatpush1.msra.mxu0 %v135_v36  ;;  %2735 = vmatprep.subr.mxu1 %v3607_v0  ;;  %v361_v23 = vld [vmem:[#allocation7 + $0xd0] sm:$0xff]  ;;  %v336_v25 = vld [vmem:[#allocation7 + $0x8] sm:$0xff]  ;;  %v358_v26 = vld [vmem:[#allocation7 + $0xb8] sm:$0xff] }
  0x68   :  { %222 = vmatprep.subr.mxu0 %v133_v38  ;;  %2736 = vmatpush3.msra.mxu1 %v140_v51  ;;  %v335_v27 = vld [vmem:[#allocation7] sm:$0xff]  ;;  %v352_v30 = vld [vmem:[#allocation7 + $0x88] sm:$0xff]  ;;  %v349_v31 = vld [vmem:[#allocation7 + $0x70] sm:$0xff] }
  0x69   :  { %223 = vmatpush1.msra.mxu0 %v132_v39  ;;  %2737 = vmatprep.subr.mxu1 %v3607_v0  ;;  %v3754_v28 = vld [vmem:[%s4260_s1] sm:$0xff]  ;;  %v346_v32 = vld [vmem:[#allocation7 + $0x58] sm:$0xff]  ;;  %v340_v34 = vld [vmem:[#allocation7 + $0x28] sm:$0xff] }
  0x6a   :  { %224 = vmatprep.subr.mxu0 %v130_v41  ;;  %2738 = vmatpush3.msra.mxu1 %v137_v54  ;;  %v355_v29 = vld [vmem:[#allocation7 + $0xa0] sm:$0xff]  ;;  %v337_v35 = vld [vmem:[#allocation7 + $0x10] sm:$0xff]  ;;  %v635_v36 = vld [vmem:[#allocation2 + $0x78] sm:$0xff] }
  0x6b   :  { %225 = vmatpush1.msra.mxu0 %v129_v42  ;;  %2739 = vmatprep.subr.mxu1 %v3607_v0  ;;  %v343_v33 = vld [vmem:[#allocation7 + $0x40] sm:$0xff]  ;;  %v634_v37 = vld [vmem:[#allocation2 + $0x70] sm:$0xff]  ;;  %v651_v38 = vld [vmem:[#allocation2 + $0xf8] sm:$0xff] }
  0x6c   :  { %259 = vmatmul.mubr.f32.vlgmr.msra.gmra.mxu0 %v127_v44  ;;  %400 = vmatprep.subr.mxu0 %v381_v45  ;;  %v633_v39 = vld [vmem:[#allocation2 + $0x68] sm:$0xff]  ;;  %v650_v40 = vld [vmem:[#allocation2 + $0xf0] sm:$0xff]  ;;  %v632_v41 = vld [vmem:[#allocation2 + $0x60] sm:$0xff] }
  0x6d   :  { %401 = vmatpush1.msra.mxu0 %v380_v46  ;;  %2740 = vmatpush3.msra.mxu1 %v134_v57  ;;  %v649_v42 = vld [vmem:[#allocation2 + $0xe8] sm:$0xff]  ;;  %v631_v43 = vld [vmem:[#allocation2 + $0x58] sm:$0xff]  ;;  %v630_v45 = vld [vmem:[#allocation2 + $0x50] sm:$0xff] }
  0x6e   :  { %402 = vmatprep.subr.mxu0 %v378_v47  ;;  %2741 = vmatprep.subr.mxu1 %v3607_v0  ;;  %v647_v46 = vld [vmem:[#allocation2 + $0xd8] sm:$0xff]  ;;  %v629_v47 = vld [vmem:[#allocation2 + $0x48] sm:$0xff]  ;;  %v646_v48 = vld [vmem:[#allocation2 + $0xd0] sm:$0xff] }
  0x6f   :  { %403 = vmatpush1.msra.mxu0 %v377_v49  ;;  %2742 = vmatpush3.msra.mxu1 %v131_v60  ;;  %v628_v49 = vld [vmem:[#allocation2 + $0x40] sm:$0xff]  ;;  %v627_v51 = vld [vmem:[#allocation2 + $0x38] sm:$0xff] }
  0x70   :  { %404 = vmatprep.subr.mxu0 %v375_v50  ;;  %464 = vmatprep.mubr.f32.mxu0 %v3607_v0  ;;  %v645_v50 = vld [vmem:[#allocation2 + $0xc8] sm:$0xff]  ;;  %v643_v54 = vld [vmem:[#allocation2 + $0xb8] sm:$0xff]  ;;  %v624_v57 = vld [vmem:[#allocation2 + $0x20] sm:$0xff] }
  0x71   :  { %405 = vmatpush1.msra.mxu0 %v374_v52  ;;  %2746 = vmatprep.subr.mxu1 %v3607_v0  ;;  %v644_v52 = vld [vmem:[#allocation2 + $0xc0] sm:$0xff] }
  0x72   :  { %406 = vmatprep.subr.mxu0 %v372_v53  ;;  %2744 = vmatmul.mubr.f32.vlgmr.msra.gmra.mxu1 %v127_v44  ;;  %v648_v44 = vld [vmem:[#allocation2 + $0xe0] sm:$0xff]  ;;  %v626_v53 = vld [vmem:[#allocation2 + $0x30] sm:$0xff] }
  0x73   :  { %407 = vmatpush1.msra.mxu0 %v371_v55  ;;  %2747 = vmatpush3.msra.mxu1 %v382_v2  ;;  %v625_v55 = vld [vmem:[#allocation2 + $0x28] sm:$0xff]  ;;  %v640_v60 = vld [vmem:[#allocation2 + $0xa0] sm:$0xff] }
  0x74   :  { %408 = vmatprep.subr.mxu0 %v369_v56  ;;  %2748 = vmatprep.subr.mxu1 %v3607_v0  ;;  %v642_v56 = vld [vmem:[#allocation2 + $0xb0] sm:$0xff]  ;;  %v620_v2 = vld [vmem:[#allocation2] sm:$0xff] }
  0x75   :  { %409 = vmatpush1.msra.mxu0 %v368_v58  ;;  %2749 = vmatpush3.msra.mxu1 %v379_v5  ;;  %v641_v58 = vld [vmem:[#allocation2 + $0xa8] sm:$0xff] }
  0x76   :  { %410 = vmatprep.subr.mxu0 %v366_v59  ;;  %2750 = vmatprep.subr.mxu1 %v3607_v0  ;;  %v623_v59 = vld [vmem:[#allocation2 + $0x18] sm:$0xff] }
  0x77   :  { %411 = vmatpush1.msra.mxu0 %v365_v61  ;;  %2751 = vmatpush3.msra.mxu1 %v376_v8  ;;  %v622_v61 = vld [vmem:[#allocation2 + $0x10] sm:$0xff] }
  0x78   :  { %412 = vmatprep.subr.mxu0 %v363_v62  ;;  %2752 = vmatprep.subr.mxu1 %v3607_v0  ;;  %v639_v62 = vld [vmem:[#allocation2 + $0x98] sm:$0xff] }
  0x79   :  { %413 = vmatpush1.msra.mxu0 %v362_v63  ;;  %2753 = vmatpush3.msra.mxu1 %v373_v11  ;;  %v621_v63 = vld [vmem:[#allocation2 + $0x8] sm:$0xff] }
  0x7a   :  { %414 = vmatprep.subr.mxu0 %v360_v1  ;;  %2754 = vmatprep.subr.mxu1 %v3607_v0  ;;  %v638_v1 = vld [vmem:[#allocation2 + $0x90] sm:$0xff] }
  0x7b   :  { %415 = vmatpush1.msra.mxu0 %v359_v3  ;;  %2755 = vmatpush3.msra.mxu1 %v370_v14  ;;  %v637_v3 = vld [vmem:[#allocation2 + $0x88] sm:$0xff] }
  0x7c   :  { %416 = vmatprep.subr.mxu0 %v357_v4  ;;  %2756 = vmatprep.subr.mxu1 %v3607_v0  ;;  %v636_v4 = vld [vmem:[#allocation2 + $0x80] sm:$0xff] }
  0x7d   :  { %417 = vmatpush1.msra.mxu0 %v356_v6  ;;  %2757 = vmatpush3.msra.mxu1 %v367_v17 }
  0x7e   :  { %418 = vmatprep.subr.mxu0 %v354_v7  ;;  %2758 = vmatprep.subr.mxu1 %v3607_v0  ;;  %v179_v7 = vlaneseq }
  0x7f   :  { %419 = vmatpush1.msra.mxu0 %v353_v9  ;;  %2759 = vmatpush3.msra.mxu1 %v364_v20 }
  0x80   :  { %420 = vmatprep.subr.mxu0 %v351_v10  ;;  %2760 = vmatprep.subr.mxu1 %v3607_v0  ;;  %v180_v8 = vshrl.u32 %v179_v7, 7  ;;  %v177_v10 = vld [vmem:[%s4266_s7] sm:$0x7] }
  0x81   :  { %421 = vmatpush1.msra.mxu0 %v350_v12  ;;  %2761 = vmatpush3.msra.mxu1 %v361_v23  ;;  %v383_v12 = vld [vmem:[%s4267_s8] sm:$0x7] }
  0x82   :  { %422 = vmatprep.subr.mxu0 %v348_v13  ;;  %2762 = vmatprep.subr.mxu1 %v3607_v0  ;;  %v181_v9 = vsub.s32 0, %v180_v8  ;;  %v660_v7 = vld [vmem:[#allocation2 + $0x140] sm:$0xff] }
  0x83   :  { %423 = vmatpush1.msra.mxu0 %v347_v15  ;;  %2763 = vmatpush3.msra.mxu1 %v358_v26 }
  0x84   :  { %424 = vmatprep.subr.mxu0 %v345_v16  ;;  %2764 = vmatprep.subr.mxu1 %v3607_v0  ;;  %v182_v13 = vrot.slane %v177_v10, %v181_v9  ;;  %v388_v14 = vrot.slane %v383_v12, %v181_v9  ;;  %v185_v16 = vsub.s32 1, %v180_v8  ;;  %v659_v9 = vld [vmem:[#allocation2 + $0x138] sm:$0xff] }
  0x85   :  { %425 = vmatpush1.msra.mxu0 %v344_v18  ;;  %2765 = vmatpush3.msra.mxu1 %v355_v29 }
  0x86   :  { %426 = vmatprep.subr.mxu0 %v342_v19  ;;  %2766 = vmatprep.subr.mxu1 %v3607_v0  ;;  %v392_v20 = vrot.slane %v383_v12, %v185_v16 }
  0x87   :  { %427 = vmatpush1.msra.mxu0 %v341_v21  ;;  %2778 = vmatprep.mubr.msk.f32.mxu1 %vm3608_vm0, %v3607_v0 }
  0x88   :  { %428 = vmatprep.subr.mxu0 %v339_v22  ;;  %2767 = vmatpush3.msra.mxu1 %v352_v30  ;;  %v186_v22 = vrot.slane %v177_v10, %v185_v16  ;;  %v673_v16 = vld [vmem:[#allocation2 + $0x1a8] sm:$0xff] }
  0x89   :  { %429 = vmatpush1.msra.mxu0 %v338_v24  ;;  %2768 = vmatprep.subr.mxu1 %v3607_v0 }
  0x8a   :  { %430 = vmatprep.subr.mxu0 %v336_v25  ;;  %2769 = vmatpush3.msra.mxu1 %v349_v31 }
  0x8b   :  { %431 = vmatpush1.msra.mxu0 %v335_v27  ;;  %2770 = vmatprep.subr.mxu1 %v3607_v0 }
  0x8c   :  { %465 = vmatmul.mubr.f32.vlgmr.msra.gmra.mxu0 %v3754_v28  ;;  %2781 = vmatprep.subr.mxu0 %v3607_v0 }
  0x8d   :  { %2813 = vmatprep.mubr.msk.f32.mxu0 %vm3608_vm0, %v3607_v0  ;;  %2771 = vmatpush3.msra.mxu1 %v346_v32 }
  0x8e   :  { %2772 = vmatprep.subr.mxu1 %v3607_v0  ;;  %2782 = vmatpush3.msra.mxu0 %v635_v36 }
  0x8f   :  { %2773 = vmatpush3.msra.mxu1 %v343_v33  ;;  %2783 = vmatprep.subr.mxu0 %v3607_v0 }
  0x90   :  { %2774 = vmatprep.subr.mxu1 %v3607_v0  ;;  %2784 = vmatpush3.msra.mxu0 %v634_v37 }
  0x91   :  { %2775 = vmatpush3.msra.mxu1 %v340_v34  ;;  %2785 = vmatprep.subr.mxu0 %v3607_v0  ;;  %v189_v34 = vsub.s32 2, %v180_v8 }
  0x92   :  { %2776 = vmatprep.subr.mxu1 %v3607_v0  ;;  %2786 = vmatpush3.msra.mxu0 %v633_v39 }
  0x93   :  { %2777 = vmatpush3.msra.mxu1 %v337_v35  ;;  %2787 = vmatprep.subr.mxu0 %v3607_v0  ;;  %v396_v35 = vrot.slane %v383_v12, %v189_v34  ;;  %v190_v37 = vrot.slane %v177_v10, %v189_v34  ;;  %v676_v10 = vld [vmem:[#allocation2 + $0x1c0] sm:$0xff]  ;;  %v675_v12 = vld [vmem:[#allocation2 + $0x1b8] sm:$0xff] }
  0x94   :  { %2779 = vmatmul.mubr.f32.vlgmr.msra.gmra.mxu1 %v3754_v28  ;;  %2816 = vmatprep.subr.mxu1 %v3607_v0  ;;  %v696_v34 = vld [vmem:[#allocation2 + $0x260] sm:$0xff] }
  0x95   :  { %2848 = vmatprep.mubr.msk.f32.mxu1 %vm3608_vm0, %v3607_v0  ;;  %2817 = vmatpush3.msra.mxu1 %v651_v38 }
  0x96   :  { %2818 = vmatprep.subr.mxu1 %v3607_v0  ;;  %2788 = vmatpush3.msra.mxu0 %v632_v41 }
  0x97   :  { %2819 = vmatpush3.msra.mxu1 %v650_v40  ;;  %2789 = vmatprep.subr.mxu0 %v3607_v0 }
  0x98   :  { %2820 = vmatprep.subr.mxu1 %v3607_v0  ;;  %2790 = vmatpush3.msra.mxu0 %v631_v43 }
  0x99   :  { %2821 = vmatpush3.msra.mxu1 %v649_v42  ;;  %2791 = vmatprep.subr.mxu0 %v3607_v0 }
  0x9a   :  { %2822 = vmatprep.subr.mxu1 %v3607_v0  ;;  %2792 = vmatpush3.msra.mxu0 %v630_v45 }
  0x9b   :  { %2823 = vmatpush3.msra.mxu1 %v648_v44  ;;  %2793 = vmatprep.subr.mxu0 %v3607_v0  ;;  %v3609_v44 = vmov 1966171168  }
  0x9c   :  { %2824 = vmatprep.subr.mxu1 %v3607_v0  ;;  %2794 = vmatpush3.msra.mxu0 %v629_v47  ;;  %v565_v45 = vunpack.c.l.s4 %v3609_v44  ;;  %v691_v44 = vld [vmem:[#allocation2 + $0x238] sm:$0xff] }
  0x9d   :  { %2825 = vmatpush3.msra.mxu1 %v647_v46  ;;  %2795 = vmatprep.subr.mxu0 %v3607_v0 }
  0x9e   :  { %2826 = vmatprep.subr.mxu1 %v3607_v0  ;;  %2796 = vmatpush3.msra.mxu0 %v628_v49  ;;  %v566_v47 = vunpack.c.0.s8 %v565_v45  ;;  %v708_v45 = vld [vmem:[#allocation2 + $0x2c0] sm:$0xff] }
  0x9f   :  { %2827 = vmatpush3.msra.mxu1 %v646_v48  ;;  %2797 = vmatprep.subr.mxu0 %v3607_v0 }
  0xa0   :  { %2828 = vmatprep.subr.mxu1 %v3607_v0  ;;  %2798 = vmatpush3.msra.mxu0 %v627_v51 }
  0xa1   :  { %2829 = vmatpush3.msra.mxu1 %v645_v50  ;;  %2799 = vmatprep.subr.mxu0 %v3607_v0  ;;  %v3812_v50 = vsub.s32 %v566_v47, %v180_v8  ;;  %v677_v8 = vld [vmem:[#allocation2 + $0x1c8] sm:$0xff]  ;;  %v707_v47 = vld [vmem:[#allocation2 + $0x2b8] sm:$0xff] }
  0xa2   :  { %2830 = vmatprep.subr.mxu1 %v3607_v0  ;;  %2800 = vmatpush3.msra.mxu0 %v626_v53 }
  0xa3   :  { %2831 = vmatpush3.msra.mxu1 %v644_v52  ;;  %2801 = vmatprep.subr.mxu0 %v3607_v0 }
  0xa4   :  { %2832 = vmatprep.subr.mxu1 %v3607_v0  ;;  %2802 = vmatpush3.msra.mxu0 %v625_v55 }
  0xa5   :  { %2833 = vmatpush3.msra.mxu1 %v643_v54  ;;  %2803 = vmatprep.subr.mxu0 %v3607_v0 }
  0xa6   :  { %2834 = vmatprep.subr.mxu1 %v3607_v0  ;;  %2804 = vmatpush3.msra.mxu0 %v624_v57 }
  0xa7   :  { %2835 = vmatpush3.msra.mxu1 %v642_v56  ;;  %2805 = vmatprep.subr.mxu0 %v3607_v0  ;;  %v667_v56 = vld [vmem:[#allocation2 + $0x178] sm:$0xff] }
  0xa8   :  { %2836 = vmatprep.subr.mxu1 %v3607_v0  ;;  %2806 = vmatpush3.msra.mxu0 %v623_v59  ;;  %v683_v59 = vld [vmem:[#allocation2 + $0x1f8] sm:$0xff] }
  0xa9   :  { %2837 = vmatpush3.msra.mxu1 %v641_v58  ;;  %2807 = vmatprep.subr.mxu0 %v3607_v0 }
  0xaa   :  { %2838 = vmatprep.subr.mxu1 %v3607_v0  ;;  %2808 = vmatpush3.msra.mxu0 %v622_v61  ;;  %v682_v61 = vld [vmem:[#allocation2 + $0x1f0] sm:$0xff] }
  0xab   :  { %2839 = vmatpush3.msra.mxu1 %v640_v60  ;;  %2809 = vmatprep.subr.mxu0 %v3607_v0  ;;  %v665_v60 = vld [vmem:[#allocation2 + $0x168] sm:$0xff] }
  0xac   :  { %2840 = vmatprep.subr.mxu1 %v3607_v0  ;;  %2810 = vmatpush3.msra.mxu0 %v621_v63  ;;  %v681_v63 = vld [vmem:[#allocation2 + $0x1e8] sm:$0xff] }
  0xad   :  { %2841 = vmatpush3.msra.mxu1 %v639_v62  ;;  %2811 = vmatprep.subr.mxu0 %v3607_v0  ;;  %v664_v62 = vld [vmem:[#allocation2 + $0x160] sm:$0xff] }
  0xae   :  { %2842 = vmatprep.subr.mxu1 %v3607_v0  ;;  %2812 = vmatpush3.msra.mxu0 %v620_v2  ;;  %v680_v2 = vld [vmem:[#allocation2 + $0x1e0] sm:$0xff] }
  0xaf   :  { %2843 = vmatpush3.msra.mxu1 %v638_v1  ;;  %2851 = vmatprep.subr.mxu0 %v3607_v0  ;;  %v663_v1 = vld [vmem:[#allocation2 + $0x158] sm:$0xff] }
  0xb0   :  { %2844 = vmatprep.subr.mxu1 %v3607_v0 }
  0xb1   :  { %2845 = vmatpush3.msra.mxu1 %v637_v3  ;;  %v662_v3 = vld [vmem:[#allocation2 + $0x150] sm:$0xff] }
  0xb2   :  { %2846 = vmatprep.subr.mxu1 %v3607_v0 }
  0xb3   :  { %2847 = vmatpush3.msra.mxu1 %v636_v4  ;;  %v679_v4 = vld [vmem:[#allocation2 + $0x1d8] sm:$0xff] }
  0xb4   :  { %2886 = vmatprep.subr.mxu1 %v3607_v0 }
 0x12c   :  { %v260_v11 = vpop.f32.mrf.mxu0 }
 0x12d   :  { %v261_v18 = vadd.f32 %v260_v11, %v182_v13  ;;  %v658_v11 = vld [vmem:[#allocation2 + $0x130] sm:$0xff]  ;;  %v657_v13 = vld [vmem:[#allocation2 + $0x128] sm:$0xff] }
 0x12e   :  { %v262_v15 = vpop.f32.mrf.mxu0 }
 0x12f   :  { %v263_v26 = vadd.f32 %v262_v15, %v186_v22  ;;  %v656_v15 = vld [vmem:[#allocation2 + $0x120] sm:$0xff]  ;;  %v670_v22 = vld [vmem:[#allocation2 + $0x190] sm:$0xff] }
 0x132   :  { %v331_v5 = vpop.f32.mrf.mxu1 }
 0x133   :  { %v332_v41 = vadd.f32 %v331_v5, %v190_v37  ;;  %v661_v5 = vld [vmem:[#allocation2 + $0x148] sm:$0xff]  ;;  %v712_v37 = vld [vmem:[#allocation2 + $0x2e0] sm:$0xff] }
 0x134   :  { %v2745_v6 = vpop.f32.mrf.mxu1 }
 0x135   :  { %v678_v6 = vld [vmem:[#allocation2 + $0x1d0] sm:$0xff] }
 0x14c   :  { %v466_v17 = vpop.f32.mrf.mxu0 }
 0x14d   :  { %v467_v19 = vadd.f32 %v466_v17, %v388_v14  ;;  %v674_v14 = vld [vmem:[#allocation2 + $0x1b0] sm:$0xff]  ;;  %v655_v17 = vld [vmem:[#allocation2 + $0x118] sm:$0xff] }
 0x14e   :  { %v468_v21 = vpop.f32.mrf.mxu0 }
 0x14f   :  { %v541_v23 = vadd.f32 %v467_v19, %v261_v18  ;;  %v469_v25 = vadd.f32 %v468_v21, %v392_v20  ;;  %v672_v18 = vld [vmem:[#allocation2 + $0x1a0] sm:$0xff]  ;;  %v654_v19 = vld [vmem:[#allocation2 + $0x110] sm:$0xff]  ;;  %v671_v20 = vld [vmem:[#allocation2 + $0x198] sm:$0xff] }
 0x150   :  { %v653_v21 = vld [vmem:[#allocation2 + $0x108] sm:$0xff] }
 0x151   :  { %v2368_v24 = vmul.f32 -1.442695, %v541_v23  ;;  %v548_v27 = vadd.f32 %v469_v25, %v263_v26  ;;  %v652_v23 = vld [vmem:[#allocation2 + $0x100] sm:$0xff] }
 0x152   :  { %v668_v26 = vld [vmem:[#allocation2 + $0x180] sm:$0xff] }
 0x153   :  { %3424 = vpow2.f32 %v2368_v24  ;;  %v2369_v29 = vmul.f32 -1.442695, %v548_v27  ;;  %v669_v24 = vld [vmem:[#allocation2 + $0x188] sm:$0xff]  ;;  %v699_v27 = vld [vmem:[#allocation2 + $0x278] sm:$0xff] }
 0x154   :  { %v537_v30 = vpop.f32.mrf.mxu1 }
 0x155   :  { %3426 = vpow2.f32 %v2369_v29  ;;  %v538_v39 = vadd.f32 %v537_v30, %v396_v35  ;;  %v698_v30 = vld [vmem:[#allocation2 + $0x270] sm:$0xff]  ;;  %v713_v35 = vld [vmem:[#allocation2 + $0x2e8] sm:$0xff] }
 0x156   :  { %v2780_v31 = vpop.f32.mrf.mxu1 }
 0x157   :  { %v715_v31 = vld [vmem:[#allocation2 + $0x2f8] sm:$0xff] }
 0x160   :  { %v3425_v32 = vpop.eup %3424 }
 0x161   :  { %v545_v33 = vadd.f32 1.0, %v3425_v32  ;;  %v697_v32 = vld [vmem:[#allocation2 + $0x268] sm:$0xff] }
 0x162   :  { %v3427_v36 = vpop.eup %3426 }
 0x163   :  { %3428 = vrcp.f32 %v545_v33  ;;  %v552_v38 = vadd.f32 1.0, %v3427_v36  ;;  %v714_v33 = vld [vmem:[#allocation2 + $0x2f0] sm:$0xff]  ;;  %v695_v36 = vld [vmem:[#allocation2 + $0x258] sm:$0xff] }
 0x165   :  { %3430 = vrcp.f32 %v552_v38  ;;  %v694_v38 = vld [vmem:[#allocation2 + $0x250] sm:$0xff] }
 0x170   :  { %v3429_v40 = vpop.eup %3428 }
 0x171   :  { %v555_v42 = vmul.f32 %v3429_v40, %v538_v39  ;;  %v711_v39 = vld [vmem:[#allocation2 + $0x2d8] sm:$0xff]  ;;  %v693_v40 = vld [vmem:[#allocation2 + $0x248] sm:$0xff] }
 0x172   :  { %v3431_v46 = vpop.eup %3430 }
 0x173   :  { %v556_v43 = vadd.f32 %v555_v42, %v332_v41  ;;  %v558_v48 = vsub.f32 1.0, %v3431_v46  ;;  %v560_v52 = vmul.f32 %v3431_v46, %v3754_v28  ;;  %v666_v28 = vld [vmem:[#allocation2 + $0x170] sm:$0xff]  ;;  %v692_v42 = vld [vmem:[#allocation2 + $0x240] sm:$0xff] }
 0x174   :  { %v710_v41 = vld [vmem:[#allocation2 + $0x2d0] sm:$0xff] }
 0x175   :  { %3432 = vtanh.f32 %v556_v43  ;;  %v709_v43 = vld [vmem:[#allocation2 + $0x2c8] sm:$0xff]  ;;  %v690_v46 = vld [vmem:[#allocation2 + $0x230] sm:$0xff] }
 0x182   :  { %v3433_v49 = vpop.eup %3432 }
 0x183   :  { %v559_v51 = vmul.f32 %v3433_v49, %v558_v48  ;;  %v689_v48 = vld [vmem:[#allocation2 + $0x228] sm:$0xff]  ;;  %v706_v49 = vld [vmem:[#allocation2 + $0x2b0] sm:$0xff] }
 0x185   :  { %v3815_v53 = vadd.f32 %v560_v52, %v559_v51  ;;  %v688_v51 = vld [vmem:[#allocation2 + $0x220] sm:$0xff]  ;;  %v705_v52 = vld [vmem:[#allocation2 + $0x2a8] sm:$0xff] }
 0x187   :  { %v570_v54 = vrot.slane %v3815_v53, %v3812_v50  ;;  %2323 = vst [vmem:[%s4273_s14] sm:$0xff] %v3815_v53 }
 0x189   :  { %v3824_v55 = vrot.slane %v570_v54, %v3812_v50  ;;  %v578_v57 = vcombine.high %v570_v54, %v570_v54  ;;  %v687_v54 = vld [vmem:[#allocation2 + $0x218] sm:$0xff] }
 0x18b   :  { %2814 = vmatmul.mubr.f32.vlgmr.msra.gmra.mxu0 %v3824_v55  ;;  %v3828_v58 = vrot.slane %v578_v57, %v3812_v50  ;;  %v608_v25 = vcombine.high %v3824_v55, %v3824_v55  ;;  %v563_v55 = vcombine.high %v3815_v53, %v3815_v53  ;;  %v686_v57 = vld [vmem:[#allocation2 + $0x210] sm:$0xff] }
 0x18c   :  { %2852 = vmatpush3.msra.mxu0 %v667_v56  ;;  %2883 = vmatprep.mubr.msk.f32.mxu0 %vm3608_vm0, %v3607_v0  ;;  %v704_v56 = vld [vmem:[#allocation2 + $0x2a0] sm:$0xff]  ;;  %v702_v53 = vld [vmem:[#allocation2 + $0x290] sm:$0xff] }
 0x18d   :  { %2853 = vmatprep.subr.mxu0 %v3607_v0  ;;  %2849 = vmatmul.mubr.f32.vlgmr.msra.gmra.mxu1 %v3828_v58  ;;  %v610_v29 = vcombine.high %v3828_v58, %v3828_v58  ;;  %v703_v58 = vld [vmem:[#allocation2 + $0x298] sm:$0xff] }
 0x18e   :  { %2854 = vmatpush3.msra.mxu0 %v666_v28  ;;  %2887 = vmatpush3.msra.mxu1 %v683_v59  ;;  %v685_v28 = vld [vmem:[#allocation2 + $0x208] sm:$0xff]  ;;  %v577_v59 = vrot.slane %v563_v55, %v3812_v50 }
 0x18f   :  { %2855 = vmatprep.subr.mxu0 %v3607_v0  ;;  %2888 = vmatprep.subr.mxu1 %v3607_v0 }
 0x190   :  { %2856 = vmatpush3.msra.mxu0 %v665_v60  ;;  %2889 = vmatpush3.msra.mxu1 %v682_v61  ;;  %v684_v60 = vld [vmem:[#allocation2 + $0x200] sm:$0xff]  ;;  %v701_v61 = vld [vmem:[#allocation2 + $0x288] sm:$0xff] }
 0x191   :  { %2857 = vmatprep.subr.mxu0 %v3607_v0  ;;  %2890 = vmatprep.subr.mxu1 %v3607_v0 }
 0x192   :  { %2858 = vmatpush3.msra.mxu0 %v664_v62  ;;  %2891 = vmatpush3.msra.mxu1 %v681_v63  ;;  %v579_v62 = vcombine.high %v577_v59, %v577_v59  ;;  %v3904_v63 = vrot.slane %v577_v59, %v3812_v50 }
 0x193   :  { %2859 = vmatprep.subr.mxu0 %v3607_v0  ;;  %2892 = vmatprep.subr.mxu1 %v3607_v0 }
 0x194   :  { %2860 = vmatpush3.msra.mxu0 %v663_v1  ;;  %2893 = vmatpush3.msra.mxu1 %v680_v2  ;;  %v700_v1 = vld [vmem:[#allocation2 + $0x280] sm:$0xff]  ;;  %v731_v2 = vld [vmem:[#allocation2 + $0x378] sm:$0xff] }
 0x195   :  { %2861 = vmatprep.subr.mxu0 %v3607_v0  ;;  %2894 = vmatprep.subr.mxu1 %v3607_v0 }
 0x196   :  { %2862 = vmatpush3.msra.mxu0 %v662_v3  ;;  %2895 = vmatpush3.msra.mxu1 %v679_v4  ;;  %v3912_v3 = vrot.slane %v579_v62, %v3812_v50  ;;  %v730_v4 = vld [vmem:[#allocation2 + $0x370] sm:$0xff]  ;;  %v728_v50 = vld [vmem:[#allocation2 + $0x360] sm:$0xff] }
 0x197   :  { %2863 = vmatprep.subr.mxu0 %v3607_v0  ;;  %2896 = vmatprep.subr.mxu1 %v3607_v0 }
 0x198   :  { %2864 = vmatpush3.msra.mxu0 %v661_v5  ;;  %2897 = vmatpush3.msra.mxu1 %v678_v6  ;;  %v747_v5 = vld [vmem:[#allocation2 + $0x3f8] sm:$0xff]  ;;  %v729_v6 = vld [vmem:[#allocation2 + $0x368] sm:$0xff] }
 0x199   :  { %2865 = vmatprep.subr.mxu0 %v3607_v0  ;;  %2898 = vmatprep.subr.mxu1 %v3607_v0 }
 0x19a   :  { %2866 = vmatpush3.msra.mxu0 %v660_v7  ;;  %2899 = vmatpush3.msra.mxu1 %v677_v8  ;;  %v746_v7 = vld [vmem:[#allocation2 + $0x3f0] sm:$0xff]  ;;  %v745_v8 = vld [vmem:[#allocation2 + $0x3e8] sm:$0xff] }
 0x19b   :  { %2867 = vmatprep.subr.mxu0 %v3607_v0  ;;  %2900 = vmatprep.subr.mxu1 %v3607_v0 }
 0x19c   :  { %2868 = vmatpush3.msra.mxu0 %v659_v9  ;;  %2901 = vmatpush3.msra.mxu1 %v676_v10  ;;  %v727_v9 = vld [vmem:[#allocation2 + $0x358] sm:$0xff]  ;;  %v744_v10 = vld [vmem:[#allocation2 + $0x3e0] sm:$0xff] }
 0x19d   :  { %2869 = vmatprep.subr.mxu0 %v3607_v0  ;;  %2902 = vmatprep.subr.mxu1 %v3607_v0 }
 0x19e   :  { %2870 = vmatpush3.msra.mxu0 %v658_v11  ;;  %2903 = vmatpush3.msra.mxu1 %v675_v12  ;;  %v726_v11 = vld [vmem:[#allocation2 + $0x350] sm:$0xff]  ;;  %v743_v12 = vld [vmem:[#allocation2 + $0x3d8] sm:$0xff] }
 0x19f   :  { %2871 = vmatprep.subr.mxu0 %v3607_v0  ;;  %2904 = vmatprep.subr.mxu1 %v3607_v0 }
 0x1a0   :  { %2872 = vmatpush3.msra.mxu0 %v657_v13  ;;  %2905 = vmatpush3.msra.mxu1 %v674_v14  ;;  %v725_v13 = vld [vmem:[#allocation2 + $0x348] sm:$0xff]  ;;  %v742_v14 = vld [vmem:[#allocation2 + $0x3d0] sm:$0xff] }
 0x1a1   :  { %2873 = vmatprep.subr.mxu0 %v3607_v0  ;;  %2906 = vmatprep.subr.mxu1 %v3607_v0 }
 0x1a2   :  { %2874 = vmatpush3.msra.mxu0 %v656_v15  ;;  %2907 = vmatpush3.msra.mxu1 %v673_v16  ;;  %v724_v15 = vld [vmem:[#allocation2 + $0x340] sm:$0xff]  ;;  %v741_v16 = vld [vmem:[#allocation2 + $0x3c8] sm:$0xff] }
 0x1a3   :  { %2875 = vmatprep.subr.mxu0 %v3607_v0  ;;  %2908 = vmatprep.subr.mxu1 %v3607_v0 }
 0x1a4   :  { %2876 = vmatpush3.msra.mxu0 %v655_v17  ;;  %2909 = vmatpush3.msra.mxu1 %v672_v18  ;;  %v723_v17 = vld [vmem:[#allocation2 + $0x338] sm:$0xff]  ;;  %v740_v18 = vld [vmem:[#allocation2 + $0x3c0] sm:$0xff] }
 0x1a5   :  { %2877 = vmatprep.subr.mxu0 %v3607_v0  ;;  %2910 = vmatprep.subr.mxu1 %v3607_v0 }
 0x1a6   :  { %2878 = vmatpush3.msra.mxu0 %v654_v19  ;;  %2911 = vmatpush3.msra.mxu1 %v671_v20  ;;  %v722_v19 = vld [vmem:[#allocation2 + $0x330] sm:$0xff]  ;;  %v739_v20 = vld [vmem:[#allocation2 + $0x3b8] sm:$0xff] }
 0x1a7   :  { %2879 = vmatprep.subr.mxu0 %v3607_v0  ;;  %2912 = vmatprep.subr.mxu1 %v3607_v0 }
 0x1a8   :  { %2880 = vmatpush3.msra.mxu0 %v653_v21  ;;  %2913 = vmatpush3.msra.mxu1 %v670_v22  ;;  %v721_v21 = vld [vmem:[#allocation2 + $0x328] sm:$0xff]  ;;  %v738_v22 = vld [vmem:[#allocation2 + $0x3b0] sm:$0xff] }
 0x1a9   :  { %2881 = vmatprep.subr.mxu0 %v3607_v0  ;;  %2914 = vmatprep.subr.mxu1 %v3607_v0 }
 0x1aa   :  { %2882 = vmatpush3.msra.mxu0 %v652_v23  ;;  %2915 = vmatpush3.msra.mxu1 %v669_v24  ;;  %v720_v23 = vld [vmem:[#allocation2 + $0x320] sm:$0xff]  ;;  %v737_v24 = vld [vmem:[#allocation2 + $0x3a8] sm:$0xff] }
 0x1ab   :  { %2884 = vmatmul.mubr.f32.vlgmr.msra.gmra.mxu0 %v608_v25  ;;  %2916 = vmatprep.subr.mxu1 %v3607_v0  ;;  %v719_v25 = vld [vmem:[#allocation2 + $0x318] sm:$0xff] }
 0x1ac   :  { %2921 = vmatprep.subr.mxu0 %v3607_v0  ;;  %2917 = vmatpush3.msra.mxu1 %v668_v26  ;;  %v736_v26 = vld [vmem:[#allocation2 + $0x3a0] sm:$0xff] }
 0x1ad   :  { %2918 = vmatprep.mubr.msk.f32.mxu1 %vm3608_vm0, %v3607_v0  ;;  %2922 = vmatpush3.msra.mxu0 %v699_v27  ;;  %v718_v27 = vld [vmem:[#allocation2 + $0x310] sm:$0xff] }
 0x1ae   :  { %2919 = vmatmul.mubr.f32.vlgmr.msra.gmra.mxu1 %v610_v29  ;;  %2923 = vmatprep.subr.mxu0 %v3607_v0  ;;  %v735_v29 = vld [vmem:[#allocation2 + $0x398] sm:$0xff] }
 0x1af   :  { %2956 = vmatprep.subr.mxu1 %v3607_v0  ;;  %2924 = vmatpush3.msra.mxu0 %v698_v30  ;;  %v717_v30 = vld [vmem:[#allocation2 + $0x308] sm:$0xff] }
 0x1b0   :  { %2957 = vmatpush3.msra.mxu1 %v715_v31  ;;  %2925 = vmatprep.subr.mxu0 %v3607_v0  ;;  %v734_v31 = vld [vmem:[#allocation2 + $0x390] sm:$0xff] }
 0x1b1   :  { %2958 = vmatprep.subr.mxu1 %v3607_v0  ;;  %2926 = vmatpush3.msra.mxu0 %v697_v32  ;;  %v716_v32 = vld [vmem:[#allocation2 + $0x300] sm:$0xff] }
 0x1b2   :  { %2959 = vmatpush3.msra.mxu1 %v714_v33  ;;  %2927 = vmatprep.subr.mxu0 %v3607_v0  ;;  %v733_v33 = vld [vmem:[#allocation2 + $0x388] sm:$0xff] }
 0x1b3   :  { %2960 = vmatprep.subr.mxu1 %v3607_v0  ;;  %2928 = vmatpush3.msra.mxu0 %v696_v34  ;;  %v609_v34 = vcombine.high %v3904_v63, %v3904_v63 }
 0x1b4   :  { %2961 = vmatpush3.msra.mxu1 %v713_v35  ;;  %2929 = vmatprep.subr.mxu0 %v3607_v0  ;;  %v732_v35 = vld [vmem:[#allocation2 + $0x380] sm:$0xff] }
 0x1b5   :  { %2962 = vmatprep.subr.mxu1 %v3607_v0  ;;  %2930 = vmatpush3.msra.mxu0 %v695_v36  ;;  %v611_v36 = vcombine.high %v3912_v3, %v3912_v3 }
 0x1b6   :  { %2963 = vmatpush3.msra.mxu1 %v712_v37  ;;  %2931 = vmatprep.subr.mxu0 %v3607_v0  ;;  %v3965_v37 = vld [vmem:[%s4263_s4] sm:$0x1] }
 0x1b7   :  { %2964 = vmatprep.subr.mxu1 %v3607_v0  ;;  %2932 = vmatpush3.msra.mxu0 %v694_v38 }
 0x1b8   :  { %2965 = vmatpush3.msra.mxu1 %v711_v39  ;;  %2933 = vmatprep.subr.mxu0 %v3607_v0 }
 0x1b9   :  { %2966 = vmatprep.subr.mxu1 %v3607_v0  ;;  %2934 = vmatpush3.msra.mxu0 %v693_v40 }
 0x1ba   :  { %2967 = vmatpush3.msra.mxu1 %v710_v41  ;;  %2935 = vmatprep.subr.mxu0 %v3607_v0 }
 0x1bb   :  { %2968 = vmatprep.subr.mxu1 %v3607_v0  ;;  %2936 = vmatpush3.msra.mxu0 %v692_v42 }
 0x1bc   :  { %2969 = vmatpush3.msra.mxu1 %v709_v43  ;;  %2937 = vmatprep.subr.mxu0 %v3607_v0 }
 0x1bd   :  { %2970 = vmatprep.subr.mxu1 %v3607_v0  ;;  %2938 = vmatpush3.msra.mxu0 %v691_v44 }
 0x1be   :  { %2971 = vmatpush3.msra.mxu1 %v708_v45  ;;  %2939 = vmatprep.subr.mxu0 %v3607_v0 }
 0x1bf   :  { %2972 = vmatprep.subr.mxu1 %v3607_v0  ;;  %2940 = vmatpush3.msra.mxu0 %v690_v46 }
 0x1c0   :  { %2973 = vmatpush3.msra.mxu1 %v707_v47  ;;  %2941 = vmatprep.subr.mxu0 %v3607_v0 }
 0x1c1   :  { %2974 = vmatprep.subr.mxu1 %v3607_v0  ;;  %2942 = vmatpush3.msra.mxu0 %v689_v48 }
 0x1c2   :  { %2975 = vmatpush3.msra.mxu1 %v706_v49  ;;  %2943 = vmatprep.subr.mxu0 %v3607_v0 }
 0x1c3   :  { %2976 = vmatprep.subr.mxu1 %v3607_v0  ;;  %2944 = vmatpush3.msra.mxu0 %v688_v51 }
 0x1c4   :  { %2977 = vmatpush3.msra.mxu1 %v705_v52  ;;  %2945 = vmatprep.subr.mxu0 %v3607_v0 }
 0x1c5   :  { %2978 = vmatprep.subr.mxu1 %v3607_v0  ;;  %2946 = vmatpush3.msra.mxu0 %v687_v54 }
 0x1c6   :  { %2979 = vmatpush3.msra.mxu1 %v704_v56  ;;  %2947 = vmatprep.subr.mxu0 %v3607_v0 }
 0x1c7   :  { %2980 = vmatprep.subr.mxu1 %v3607_v0  ;;  %2948 = vmatpush3.msra.mxu0 %v686_v57 }
 0x1c8   :  { %2981 = vmatpush3.msra.mxu1 %v703_v58  ;;  %2949 = vmatprep.subr.mxu0 %v3607_v0 }
 0x1c9   :  { %2982 = vmatprep.subr.mxu1 %v3607_v0  ;;  %2950 = vmatpush3.msra.mxu0 %v685_v28 }
 0x1ca   :  { %2983 = vmatpush3.msra.mxu1 %v702_v53  ;;  %2951 = vmatprep.subr.mxu0 %v3607_v0 }
 0x1cb   :  { %2984 = vmatprep.subr.mxu1 %v3607_v0  ;;  %2952 = vmatpush3.msra.mxu0 %v684_v60 }
 0x1cc   :  { %2953 = vmatprep.mubr.msk.f32.mxu0 %vm3608_vm0, %v3607_v0  ;;  %2985 = vmatpush3.msra.mxu1 %v701_v61 }
 0x1cd   :  { %2954 = vmatmul.mubr.f32.vlgmr.msra.gmra.mxu0 %v3904_v63  ;;  %2986 = vmatprep.subr.mxu1 %v3607_v0 }
 0x1ce   :  { %2991 = vmatprep.subr.mxu0 %v3607_v0  ;;  %2987 = vmatpush3.msra.mxu1 %v700_v1 }
 0x1cf   :  { %2988 = vmatprep.mubr.msk.f32.mxu1 %vm3608_vm0, %v3607_v0  ;;  %2992 = vmatpush3.msra.mxu0 %v731_v2  ;;  %v1437_v2 = vld [vmem:[#allocation4 + $0x78] sm:$0xff] }
 0x1d0   :  { %2989 = vmatmul.mubr.f32.vlgmr.msra.gmra.mxu1 %v3912_v3  ;;  %2993 = vmatprep.subr.mxu0 %v3607_v0  ;;  %v1436_v3 = vld [vmem:[#allocation4 + $0x70] sm:$0xff] }
 0x1d1   :  { %3026 = vmatprep.subr.mxu1 %v3607_v0  ;;  %2994 = vmatpush3.msra.mxu0 %v730_v4  ;;  %v1453_v4 = vld [vmem:[#allocation4 + $0xf8] sm:$0xff] }
 0x1d2   :  { %3027 = vmatpush3.msra.mxu1 %v747_v5  ;;  %2995 = vmatprep.subr.mxu0 %v3607_v0  ;;  %v1452_v5 = vld [vmem:[#allocation4 + $0xf0] sm:$0xff] }
 0x1d3   :  { %3028 = vmatprep.subr.mxu1 %v3607_v0  ;;  %2996 = vmatpush3.msra.mxu0 %v729_v6 }
 0x1d4   :  { %3029 = vmatpush3.msra.mxu1 %v746_v7  ;;  %2997 = vmatprep.subr.mxu0 %v3607_v0  ;;  %v1435_v7 = vld [vmem:[#allocation4 + $0x68] sm:$0xff] }
 0x1d5   :  { %3030 = vmatprep.subr.mxu1 %v3607_v0  ;;  %2998 = vmatpush3.msra.mxu0 %v728_v50  ;;  %v1451_v50 = vld [vmem:[#allocation4 + $0xe8] sm:$0xff] }
 0x1d6   :  { %3031 = vmatpush3.msra.mxu1 %v745_v8  ;;  %2999 = vmatprep.subr.mxu0 %v3607_v0  ;;  %v1434_v8 = vld [vmem:[#allocation4 + $0x60] sm:$0xff] }
 0x1d7   :  { %3032 = vmatprep.subr.mxu1 %v3607_v0  ;;  %3000 = vmatpush3.msra.mxu0 %v727_v9  ;;  %v1433_v9 = vld [vmem:[#allocation4 + $0x58] sm:$0xff] }
 0x1d8   :  { %3033 = vmatpush3.msra.mxu1 %v744_v10  ;;  %3001 = vmatprep.subr.mxu0 %v3607_v0 }
 0x1d9   :  { %3034 = vmatprep.subr.mxu1 %v3607_v0  ;;  %3002 = vmatpush3.msra.mxu0 %v726_v11 }
 0x1da   :  { %3035 = vmatpush3.msra.mxu1 %v743_v12  ;;  %3003 = vmatprep.subr.mxu0 %v3607_v0 }
 0x1db   :  { %3036 = vmatprep.subr.mxu1 %v3607_v0  ;;  %3004 = vmatpush3.msra.mxu0 %v725_v13 }
 0x1dc   :  { %3037 = vmatpush3.msra.mxu1 %v742_v14  ;;  %3005 = vmatprep.subr.mxu0 %v3607_v0 }
 0x1dd   :  { %3038 = vmatprep.subr.mxu1 %v3607_v0  ;;  %3006 = vmatpush3.msra.mxu0 %v724_v15 }
 0x1de   :  { %3039 = vmatpush3.msra.mxu1 %v741_v16  ;;  %3007 = vmatprep.subr.mxu0 %v3607_v0 }
 0x1df   :  { %3040 = vmatprep.subr.mxu1 %v3607_v0  ;;  %3008 = vmatpush3.msra.mxu0 %v723_v17 }
 0x1e0   :  { %3041 = vmatpush3.msra.mxu1 %v740_v18  ;;  %3009 = vmatprep.subr.mxu0 %v3607_v0 }
 0x1e1   :  { %3042 = vmatprep.subr.mxu1 %v3607_v0  ;;  %3010 = vmatpush3.msra.mxu0 %v722_v19 }
 0x1e2   :  { %3043 = vmatpush3.msra.mxu1 %v739_v20  ;;  %3011 = vmatprep.subr.mxu0 %v3607_v0 }
 0x1e3   :  { %3044 = vmatprep.subr.mxu1 %v3607_v0  ;;  %3012 = vmatpush3.msra.mxu0 %v721_v21 }
 0x1e4   :  { %3045 = vmatpush3.msra.mxu1 %v738_v22  ;;  %3013 = vmatprep.subr.mxu0 %v3607_v0 }
 0x1e5   :  { %3046 = vmatprep.subr.mxu1 %v3607_v0  ;;  %3014 = vmatpush3.msra.mxu0 %v720_v23 }
 0x1e6   :  { %3047 = vmatpush3.msra.mxu1 %v737_v24  ;;  %3015 = vmatprep.subr.mxu0 %v3607_v0 }
 0x1e7   :  { %3048 = vmatprep.subr.mxu1 %v3607_v0  ;;  %3016 = vmatpush3.msra.mxu0 %v719_v25 }
 0x1e8   :  { %3049 = vmatpush3.msra.mxu1 %v736_v26  ;;  %3017 = vmatprep.subr.mxu0 %v3607_v0  ;;  %v1432_v26 = vld [vmem:[#allocation4 + $0x50] sm:$0xff] }
 0x1e9   :  { %3050 = vmatprep.subr.mxu1 %v3607_v0  ;;  %3018 = vmatpush3.msra.mxu0 %v718_v27  ;;  %v1450_v27 = vld [vmem:[#allocation4 + $0xe0] sm:$0xff] }
 0x1ea   :  { %3051 = vmatpush3.msra.mxu1 %v735_v29  ;;  %3019 = vmatprep.subr.mxu0 %v3607_v0 }
 0x1eb   :  { %3052 = vmatprep.subr.mxu1 %v3607_v0  ;;  %3020 = vmatpush3.msra.mxu0 %v717_v30 }
 0x1ec   :  { %3053 = vmatpush3.msra.mxu1 %v734_v31  ;;  %3021 = vmatprep.subr.mxu0 %v3607_v0  ;;  %v1431_v31 = vld [vmem:[#allocation4 + $0x48] sm:$0xff] }
 0x1ed   :  { %3054 = vmatprep.subr.mxu1 %v3607_v0  ;;  %3022 = vmatpush3.msra.mxu0 %v716_v32  ;;  %v1449_v32 = vld [vmem:[#allocation4 + $0xd8] sm:$0xff] }
 0x1ee   :  { %3023 = vmatprep.mubr.msk.f32.mxu0 %vm3608_vm0, %v3607_v0  ;;  %3055 = vmatpush3.msra.mxu1 %v733_v33 }
 0x1ef   :  { %3024 = vmatmul.mubr.f32.vlgmr.msra.gmra.mxu0 %v609_v34  ;;  %3056 = vmatprep.subr.mxu1 %v3607_v0  ;;  %v1430_v34 = vld [vmem:[#allocation4 + $0x40] sm:$0xff] }
 0x1f0   :  { %3057 = vmatpush3.msra.mxu1 %v732_v35  ;;  %3058 = vmatprep.mubr.msk.f32.mxu1 %vm3608_vm0, %v3607_v0  ;;  %v1448_v35 = vld [vmem:[#allocation4 + $0xd0] sm:$0xff] }
 0x1f1   :  { %3059 = vmatmul.mubr.f32.vlgmr.msra.gmra.mxu1 %v611_v36  ;;  %3061 = vmatprep.subr.mxu0 %v3607_v0 }
 0x1f2   :  { %3096 = vmatprep.subr.mxu1 %v3607_v0  ;;  %3093 = vmatprep.mubr.msk.f32.mxu0 %vm3608_vm0, %v3607_v0 }
 0x1f3   :  { %3128 = vmatprep.mubr.msk.f32.mxu1 %vm3608_vm0, %v3607_v0  ;;  %3062 = vmatpush3.msra.mxu0 %v1437_v2 }
 0x1f4   :  { %3063 = vmatprep.subr.mxu0 %v3607_v0  ;;  %3097 = vmatpush3.msra.mxu1 %v1453_v4 }
 0x1f5   :  { %3064 = vmatpush3.msra.mxu0 %v1436_v3  ;;  %3098 = vmatprep.subr.mxu1 %v3607_v0 }
 0x1f6   :  { %3065 = vmatprep.subr.mxu0 %v3607_v0  ;;  %3099 = vmatpush3.msra.mxu1 %v1452_v5 }
 0x1f7   :  { %3066 = vmatpush3.msra.mxu0 %v1435_v7  ;;  %3100 = vmatprep.subr.mxu1 %v3607_v0 }
 0x1f8   :  { %3067 = vmatprep.subr.mxu0 %v3607_v0  ;;  %3101 = vmatpush3.msra.mxu1 %v1451_v50 }
 0x1f9   :  { %3068 = vmatpush3.msra.mxu0 %v1434_v8  ;;  %3102 = vmatprep.subr.mxu1 %v3607_v0 }
 0x1fa   :  { %3069 = vmatprep.subr.mxu0 %v3607_v0  ;;  %3103 = vmatpush3.msra.mxu1 %v1450_v27 }
 0x1fb   :  { %3070 = vmatpush3.msra.mxu0 %v1433_v9  ;;  %3104 = vmatprep.subr.mxu1 %v3607_v0 }
 0x1fc   :  { %3071 = vmatprep.subr.mxu0 %v3607_v0  ;;  %3105 = vmatpush3.msra.mxu1 %v1449_v32 }
 0x1fd   :  { %3072 = vmatpush3.msra.mxu0 %v1432_v26  ;;  %3106 = vmatprep.subr.mxu1 %v3607_v0 }
 0x1fe   :  { %3073 = vmatprep.subr.mxu0 %v3607_v0  ;;  %3107 = vmatpush3.msra.mxu1 %v1448_v35  ;;  %v1465_v35 = vld [vmem:[#allocation4 + $0x158] sm:$0xff] }
 0x1ff   :  { %3074 = vmatpush3.msra.mxu0 %v1431_v31  ;;  %3108 = vmatprep.subr.mxu1 %v3607_v0  ;;  %v1485_v31 = vld [vmem:[#allocation4 + $0x1f8] sm:$0xff] }
 0x200   :  { %3075 = vmatprep.subr.mxu0 %v3607_v0 }
 0x201   :  { %3076 = vmatpush3.msra.mxu0 %v1430_v34  ;;  %v1466_v34 = vld [vmem:[#allocation4 + $0x160] sm:$0xff] }
 0x202   :  { %3077 = vmatprep.subr.mxu0 %v3607_v0 }
 0x24b   :  { %v815_v38 = vpop.f32.mrf.mxu0 }
 0x24c   :  { %v816_v39 = vadd.f32 %v815_v38, %v3965_v37  ;;  %v1447_v38 = vld [vmem:[#allocation4 + $0xc8] sm:$0xff] }
 0x24d   :  { %v2815_v40 = vpop.f32.mrf.mxu0  ;;  %v885_v41 = vpop.f32.mrf.mxu1  ;;  %3109 = vmatpush3.msra.mxu1 %v1447_v38  ;;  %v1464_v38 = vld [vmem:[#allocation4 + $0x150] sm:$0xff] }
 0x24e   :  { %v886_v42 = vadd.f32 %v885_v41, %v3965_v37  ;;  %v1310_v43 = vsel %vm1309_vm1, %v816_v39, -inf  ;;  %3110 = vmatprep.subr.mxu1 %v3607_v0  ;;  %v1446_v40 = vld [vmem:[#allocation4 + $0xc0] sm:$0xff]  ;;  %v1427_v41 = vld [vmem:[#allocation4 + $0x28] sm:$0xff] }
 0x24f   :  { %1311 = vmax.xlane.f32.xlu0 %v1310_v43  ;;  %v2850_v44 = vpop.f32.mrf.mxu1  ;;  %3111 = vmatpush3.msra.mxu1 %v1446_v40  ;;  %v1426_v43 = vld [vmem:[#allocation4 + $0x20] sm:$0xff] }
 0x250   :  { %v1313_v45 = vsel %vm1309_vm1, %v886_v42, -inf  ;;  %3112 = vmatprep.subr.mxu1 %v3607_v0  ;;  %v1444_v44 = vld [vmem:[#allocation4 + $0xb0] sm:$0xff]  ;;  %v1482_v40 = vld [vmem:[#allocation4 + $0x1e0] sm:$0xff] }
 0x253   :  { %1314 = vmax.xlane.f32.xlu0 %v1313_v45  ;;  %v1425_v45 = vld [vmem:[#allocation4 + $0x18] sm:$0xff] }
 0x26b   :  { %v955_v46 = vpop.f32.mrf.mxu0 }
 0x26c   :  { %v3972_v47 = vadd.f32 %v955_v46, %v3965_v37  ;;  %v1443_v46 = vld [vmem:[#allocation4 + $0xa8] sm:$0xff] }
 0x26d   :  { %v2885_v48 = vpop.f32.mrf.mxu0 }
 0x26e   :  { %v1025_v49 = vpop.f32.mrf.mxu1  ;;  %v1316_v51 = vsel %vm1309_vm1, %v3972_v47, -inf  ;;  %v1424_v48 = vld [vmem:[#allocation4 + $0x10] sm:$0xff] }
 0x26f   :  { %v3977_v52 = vadd.f32 %v1025_v49, %v3965_v37  ;;  %1317 = vmax.xlane.f32.xlu1 %v1316_v51  ;;  %v1442_v49 = vld [vmem:[#allocation4 + $0xa0] sm:$0xff] }
 0x270   :  { %v2920_v54 = vpop.f32.mrf.mxu1 }
 0x271   :  { %v1319_v55 = vsel %vm1309_vm1, %v3977_v52, -inf  ;;  %v1441_v54 = vld [vmem:[#allocation4 + $0x98] sm:$0xff] }
 0x273   :  { %1320 = vmax.xlane.f32.xlu1 %v1319_v55 }
 0x28d   :  { %v1095_v56 = vpop.f32.mrf.mxu0 }
 0x28e   :  { %v3982_v57 = vadd.f32 %v1095_v56, %v3965_v37  ;;  %v1422_v56 = vld [vmem:[#allocation4] sm:$0xff] }
 0x28f   :  { %v2955_v58 = vpop.f32.mrf.mxu0 }
 0x290   :  { %v1165_v28 = vpop.f32.mrf.mxu1  ;;  %v1322_v59 = vsel %vm1309_vm1, %v3982_v57, -inf  ;;  %v1440_v58 = vld [vmem:[#allocation4 + $0x90] sm:$0xff] }
 0x291   :  { %v3987_v53 = vadd.f32 %v1165_v28, %v3965_v37  ;;  %1323 = vmax.xlane.f32.xlu0 %v1322_v59  ;;  %v1439_v59 = vld [vmem:[#allocation4 + $0x88] sm:$0xff] }
 0x292   :  { %v2990_v60 = vpop.f32.mrf.mxu1 }
 0x293   :  { %v1325_v61 = vsel %vm1309_vm1, %v3987_v53, -inf  ;;  %v1438_v60 = vld [vmem:[#allocation4 + $0x80] sm:$0xff] }
 0x294   :  { %1326 = vmax.xlane.f32.xlu1 %v1325_v61 }
 0x2af   :  { %v1235_v62 = vpop.f32.mrf.mxu0 }
 0x2b0   :  { %v4002_v17 = vadd.f32 %v1235_v62, %v3965_v37 }
 0x2b1   :  { %v3025_v63 = vpop.f32.mrf.mxu0  ;;  %v1305_v1 = vpop.f32.mrf.mxu1 }
 0x2b2   :  { %v4009_v20 = vadd.f32 %v1305_v1, %v3965_v37  ;;  %v1328_v21 = vsel %vm1309_vm1, %v4002_v17, -inf  ;;  %v1429_v37 = vld [vmem:[#allocation4 + $0x38] sm:$0xff] }
 0x2b3   :  { %v3060_v6 = vpop.f32.mrf.mxu1  ;;  %3078 = vmatpush3.msra.mxu0 %v1429_v37  ;;  %v1483_v37 = vld [vmem:[#allocation4 + $0x1e8] sm:$0xff] }
 0x2b4   :  { %v1331_v23 = vsel %vm1309_vm1, %v4009_v20, -inf  ;;  %3079 = vmatprep.subr.mxu0 %v3607_v0 }
 0x2d8   :  { %v1312_v10 = vpop.xlane.xlu0 %1311 }
 0x2d9   :  { %v1334_v11 = vsub.f32 %v816_v39, %v1312_v10  ;;  %v1428_v39 = vld [vmem:[#allocation4 + $0x30] sm:$0xff] }
 0x2da   :  { %3080 = vmatpush3.msra.mxu0 %v1428_v39 }
 0x2db   :  { %v1342_v12 = vmul.f32 1.442695, %v1334_v11  ;;  %3081 = vmatprep.subr.mxu0 %v3607_v0 }
 0x2dc   :  { %v1315_v13 = vpop.xlane.xlu0 %1314  ;;  %3082 = vmatpush3.msra.mxu0 %v1427_v41  ;;  %v1463_v41 = vld [vmem:[#allocation4 + $0x148] sm:$0xff] }
 0x2dd   :  { %3434 = vpow2.f32 %v1342_v12  ;;  %v1335_v14 = vsub.f32 %v886_v42, %v1315_v13  ;;  %v1445_v42 = vld [vmem:[#allocation4 + $0xb8] sm:$0xff]  ;;  %3083 = vmatprep.subr.mxu0 %v3607_v0 }
 0x2de   :  { %3113 = vmatpush3.msra.mxu1 %v1445_v42  ;;  %3084 = vmatpush3.msra.mxu0 %v1426_v43  ;;  %v1481_v42 = vld [vmem:[#allocation4 + $0x1d8] sm:$0xff]  ;;  %v1462_v43 = vld [vmem:[#allocation4 + $0x140] sm:$0xff] }
 0x2df   :  { %v1344_v15 = vmul.f32 1.442695, %v1335_v14  ;;  %3114 = vmatprep.subr.mxu1 %v3607_v0  ;;  %3085 = vmatprep.subr.mxu0 %v3607_v0 }
 0x2e0   :  { %3115 = vmatpush3.msra.mxu1 %v1444_v44  ;;  %3086 = vmatpush3.msra.mxu0 %v1425_v45  ;;  %v1480_v45 = vld [vmem:[#allocation4 + $0x1d0] sm:$0xff] }
 0x2e1   :  { %3436 = vpow2.f32 %v1344_v15  ;;  %3116 = vmatprep.subr.mxu1 %v3607_v0  ;;  %3087 = vmatprep.subr.mxu0 %v3607_v0 }
 0x2e2   :  { %3117 = vmatpush3.msra.mxu1 %v1443_v46  ;;  %3088 = vmatpush3.msra.mxu0 %v1424_v48  ;;  %v1461_v46 = vld [vmem:[#allocation4 + $0x138] sm:$0xff]  ;;  %v1479_v48 = vld [vmem:[#allocation4 + $0x1c8] sm:$0xff] }
 0x2e3   :  { %3118 = vmatprep.subr.mxu1 %v3607_v0  ;;  %3089 = vmatprep.subr.mxu0 %v3607_v0 }
 0x2e4   :  { %3119 = vmatpush3.msra.mxu1 %v1442_v49  ;;  %v1460_v49 = vld [vmem:[#allocation4 + $0x130] sm:$0xff] }
 0x2e5   :  { %3120 = vmatprep.subr.mxu1 %v3607_v0 }
 0x2e6   :  { %3121 = vmatpush3.msra.mxu1 %v1441_v54  ;;  %v1477_v54 = vld [vmem:[#allocation4 + $0x1b8] sm:$0xff] }
 0x2e7   :  { %3122 = vmatprep.subr.mxu1 %v3607_v0 }
 0x2e8   :  { %3123 = vmatpush3.msra.mxu1 %v1440_v58  ;;  %v1476_v58 = vld [vmem:[#allocation4 + $0x1b0] sm:$0xff] }
 0x2e9   :  { %3124 = vmatprep.subr.mxu1 %v3607_v0 }
 0x2ea   :  { %v3999_v16 = vpop.eup %3434  ;;  %3125 = vmatpush3.msra.mxu1 %v1439_v59 }
 0x2eb   :  { %v1358_v18 = vsel %vm1309_vm1, %v3999_v16, 0.0  ;;  %3126 = vmatprep.subr.mxu1 %v3607_v0 }
 0x2ec   :  { %1359 = vadd.xlane.f32.xlu0 %v1358_v18  ;;  %3127 = vmatpush3.msra.mxu1 %v1438_v60  ;;  %v1475_v60 = vld [vmem:[#allocation4 + $0x1a8] sm:$0xff] }
 0x2ed   :  { %3166 = vmatprep.subr.mxu1 %v3607_v0 }
 0x2ee   :  { %v4006_v19 = vpop.eup %3436 }
 0x2ef   :  { %v1361_v22 = vsel %vm1309_vm1, %v4006_v19, 0.0 }
 0x2f0   :  { %1329 = vmax.xlane.f32.xlu0 %v1328_v21  ;;  %1362 = vadd.xlane.f32.xlu1 %v1361_v22 }
 0x2f4   :  { %1332 = vmax.xlane.f32.xlu1 %v1331_v23 }
 0x2f8   :  { %v1318_v24 = vpop.xlane.xlu1 %1317 }
 0x2f9   :  { %v1336_v25 = vsub.f32 %v3972_v47, %v1318_v24 }
 0x2fb   :  { %v1346_v29 = vmul.f32 1.442695, %v1336_v25  ;;  %v1469_v25 = vld [vmem:[#allocation4 + $0x178] sm:$0xff] }
 0x2fc   :  { %v1321_v30 = vpop.xlane.xlu1 %1320 }
 0x2fd   :  { %3438 = vpow2.f32 %v1346_v29  ;;  %v1337_v33 = vsub.f32 %v3977_v52, %v1321_v30  ;;  %v1423_v52 = vld [vmem:[#allocation4 + $0x8] sm:$0xff] }
 0x2fe   :  { %3090 = vmatpush3.msra.mxu0 %v1423_v52  ;;  %v1467_v30 = vld [vmem:[#allocation4 + $0x168] sm:$0xff] }
 0x2ff   :  { %v1348_v36 = vmul.f32 1.442695, %v1337_v33  ;;  %3091 = vmatprep.subr.mxu0 %v3607_v0  ;;  %v1459_v52 = vld [vmem:[#allocation4 + $0x128] sm:$0xff] }
 0x300   :  { %3092 = vmatpush3.msra.mxu0 %v1422_v56  ;;  %v1458_v56 = vld [vmem:[#allocation4 + $0x120] sm:$0xff] }
 0x301   :  { %3440 = vpow2.f32 %v1348_v36  ;;  %3131 = vmatprep.subr.mxu0 %v3607_v0 }
 0x30a   :  { %v4033_v47 = vpop.eup %3438 }
 0x30b   :  { %v1364_v51 = vsel %vm1309_vm1, %v4033_v47, 0.0 }
 0x30c   :  { %1365 = vadd.xlane.f32.xlu0 %v1364_v51  ;;  %v1478_v51 = vld [vmem:[#allocation4 + $0x1c0] sm:$0xff] }
 0x30e   :  { %v4041_v55 = vpop.eup %3440 }
 0x30f   :  { %v1367_v28 = vsel %vm1309_vm1, %v4041_v55, 0.0 }
 0x310   :  { %1368 = vadd.xlane.f32.xlu1 %v1367_v28  ;;  %v1457_v28 = vld [vmem:[#allocation4 + $0x118] sm:$0xff] }
 0x31a   :  { %v1324_v61 = vpop.xlane.xlu0 %1323 }
 0x31b   :  { %v1338_v62 = vsub.f32 %v3982_v57, %v1324_v61 }
 0x31d   :  { %v1350_v63 = vmul.f32 1.442695, %v1338_v62  ;;  %v1327_v1 = vpop.xlane.xlu1 %1326  ;;  %v1456_v62 = vld [vmem:[#allocation4 + $0x110] sm:$0xff] }
 0x31e   :  { %v1339_v2 = vsub.f32 %v3987_v53, %v1327_v1 }
 0x31f   :  { %3442 = vpow2.f32 %v1350_v63  ;;  %v1474_v63 = vld [vmem:[#allocation4 + $0x1a0] sm:$0xff] }
 0x320   :  { %v1352_v3 = vmul.f32 1.442695, %v1339_v2  ;;  %v1455_v2 = vld [vmem:[#allocation4 + $0x108] sm:$0xff] }
 0x322   :  { %3444 = vpow2.f32 %v1352_v3 }
 0x32c   :  { %v4053_v4 = vpop.eup %3442 }
 0x32d   :  { %v1370_v5 = vsel %vm1309_vm1, %v4053_v4, 0.0 }
 0x32e   :  { %1371 = vadd.xlane.f32.xlu0 %v1370_v5  ;;  %v1473_v5 = vld [vmem:[#allocation4 + $0x198] sm:$0xff] }
 0x32f   :  { %v4057_v6 = vpop.eup %3444 }
 0x330   :  { %v1373_v7 = vsel %vm1309_vm1, %v4057_v6, 0.0 }
 0x331   :  { %1374 = vadd.xlane.f32.xlu1 %v1373_v7 }
 0x375   :  { %v1360_v57 = vpop.xlane.xlu0 %1359 }
 0x376   :  { %3446 = vrcp.f32 %v1360_v57 }
 0x379   :  { %v1330_v50 = vpop.xlane.xlu0 %1329  ;;  %v1363_v8 = vpop.xlane.xlu1 %1362 }
 0x37a   :  { %v1340_v53 = vsub.f32 %v4002_v17, %v1330_v50  ;;  %3448 = vrcp.f32 %v1363_v8  ;;  %v1454_v50 = vld [vmem:[#allocation4 + $0x100] sm:$0xff] }
 0x37c   :  { %v1354_v9 = vmul.f32 1.442695, %v1340_v53 }
 0x37d   :  { %v1333_v10 = vpop.xlane.xlu1 %1332 }
 0x37e   :  { %3450 = vpow2.f32 %v1354_v9  ;;  %v1341_v11 = vsub.f32 %v4009_v20, %v1333_v10  ;;  %v1468_v20 = vld [vmem:[#allocation4 + $0x170] sm:$0xff]  ;;  %v1471_v10 = vld [vmem:[#allocation4 + $0x188] sm:$0xff] }
 0x380   :  { %v1356_v12 = vmul.f32 1.442695, %v1341_v11  ;;  %v1501_v11 = vld [vmem:[#allocation4 + $0x278] sm:$0xff] }
 0x382   :  { %3452 = vpow2.f32 %v1356_v12 }
 0x383   :  { %v3447_v13 = vpop.eup %3446 }
 0x384   :  { %v1390_v14 = vmul.f32 %v3447_v13, %v1360_v57 }
 0x386   :  { %v1398_v15 = vsub.f32 2.0, %v1390_v14  ;;  %v1470_v14 = vld [vmem:[#allocation4 + $0x180] sm:$0xff] }
 0x387   :  { %v3449_v18 = vpop.eup %3448 }
 0x388   :  { %v1406_v21 = vmul.f32 %v3447_v13, %v1398_v15  ;;  %v1391_v22 = vmul.f32 %v3449_v18, %v1363_v8  ;;  %v1472_v8 = vld [vmem:[#allocation4 + $0x190] sm:$0xff] }
 0x389   :  { %v1500_v15 = vld [vmem:[#allocation4 + $0x270] sm:$0xff] }
 0x38a   :  { %v1414_v23 = vmul.f32 %v3999_v16, %v1406_v21  ;;  %v1399_v24 = vsub.f32 2.0, %v1391_v22  ;;  %v1499_v22 = vld [vmem:[#allocation4 + $0x268] sm:$0xff] }
 0x38b   :  { %v4064_v26 = vpop.eup %3450 }
 0x38c   :  { %v1407_v17 = vmul.f32 %v3449_v18, %v1399_v24  ;;  %3094 = vmatmul.mubr.f32.vlgmr.msra.gmra.mxu0 %v1414_v23  ;;  %v1376_v27 = vsel %vm1309_vm1, %v4064_v26, 0.0  ;;  %v1516_v24 = vld [vmem:[#allocation4 + $0x2f0] sm:$0xff] }
 0x38d   :  { %3132 = vmatpush3.msra.mxu0 %v1469_v25  ;;  %1377 = vadd.xlane.f32.xlu0 %v1376_v27  ;;  %v1515_v27 = vld [vmem:[#allocation4 + $0x2e8] sm:$0xff] }
 0x38e   :  { %v1415_v29 = vmul.f32 %v4006_v19, %v1407_v17  ;;  %3133 = vmatprep.subr.mxu0 %v3607_v0  ;;  %3163 = vmatprep.mubr.msk.f32.mxu0 %vm3608_vm0, %v3607_v0  ;;  %v1484_v19 = vld [vmem:[#allocation4 + $0x1f0] sm:$0xff]  ;;  %v1497_v17 = vld [vmem:[#allocation4 + $0x258] sm:$0xff] }
 0x38f   :  { %v4072_v16 = vpop.eup %3452  ;;  %3134 = vmatpush3.msra.mxu0 %v1468_v20  ;;  %v1496_v20 = vld [vmem:[#allocation4 + $0x250] sm:$0xff] }
 0x390   :  { %v2332_v32 = vrot.slane %v1415_v29, 7  ;;  %3135 = vmatprep.subr.mxu0 %v3607_v0  ;;  %3129 = vmatmul.mubr.f32.vlgmr.msra.gmra.mxu1 %v1415_v29  ;;  %v1379_v33 = vsel %vm1309_vm1, %v4072_v16, 0.0  ;;  %v1514_v29 = vld [vmem:[#allocation4 + $0x2e0] sm:$0xff] }
 0x391   :  { %3136 = vmatpush3.msra.mxu0 %v1467_v30  ;;  %3167 = vmatpush3.msra.mxu1 %v1485_v31  ;;  %v1495_v31 = vld [vmem:[#allocation4 + $0x248] sm:$0xff] }
 0x392   :  { %3137 = vmatprep.subr.mxu0 %v3607_v0  ;;  %3168 = vmatprep.subr.mxu1 %v3607_v0  ;;  %v4080_v36 = vsel %vm2151_vm2, %v2332_v32, %v1414_v23  ;;  %v1517_v23 = vld [vmem:[#allocation4 + $0x2f8] sm:$0xff] }
 0x393   :  { %1380 = vadd.xlane.f32.xlu1 %v1379_v33  ;;  %3138 = vmatpush3.msra.mxu0 %v1466_v34  ;;  %v1513_v32 = vld [vmem:[#allocation4 + $0x2d8] sm:$0xff]  ;;  %v1494_v34 = vld [vmem:[#allocation4 + $0x240] sm:$0xff] }
 0x394   :  { %3169 = vmatpush3.msra.mxu1 %v1484_v19  ;;  %3139 = vmatprep.subr.mxu0 %v3607_v0  ;;  %v1512_v19 = vld [vmem:[#allocation4 + $0x2d0] sm:$0xff] }
 0x395   :  { %3170 = vmatprep.subr.mxu1 %v3607_v0  ;;  %3140 = vmatpush3.msra.mxu0 %v1465_v35  ;;  %v1366_v39 = vpop.xlane.xlu0 %1365  ;;  %v1493_v35 = vld [vmem:[#allocation4 + $0x238] sm:$0xff] }
 0x396   :  { %3454 = vrcp.f32 %v1366_v39  ;;  %3171 = vmatpush3.msra.mxu1 %v1483_v37  ;;  %3141 = vmatprep.subr.mxu0 %v3607_v0  ;;  %v1492_v37 = vld [vmem:[#allocation4 + $0x230] sm:$0xff] }
 0x397   :  { %3172 = vmatprep.subr.mxu1 %v3607_v0  ;;  %3142 = vmatpush3.msra.mxu0 %v1464_v38  ;;  %v1510_v38 = vld [vmem:[#allocation4 + $0x2c0] sm:$0xff] }
 0x398   :  { %3173 = vmatpush3.msra.mxu1 %v1482_v40  ;;  %3143 = vmatprep.subr.mxu0 %v3607_v0  ;;  %v1509_v40 = vld [vmem:[#allocation4 + $0x2b8] sm:$0xff] }
 0x399   :  { %3174 = vmatprep.subr.mxu1 %v3607_v0  ;;  %3144 = vmatpush3.msra.mxu0 %v1463_v41  ;;  %v1369_v44 = vpop.xlane.xlu1 %1368  ;;  %v1490_v41 = vld [vmem:[#allocation4 + $0x220] sm:$0xff] }
 0x39a   :  { %3175 = vmatpush3.msra.mxu1 %v1481_v42  ;;  %3456 = vrcp.f32 %v1369_v44  ;;  %3145 = vmatprep.subr.mxu0 %v3607_v0  ;;  %v1508_v42 = vld [vmem:[#allocation4 + $0x2b0] sm:$0xff] }
 0x39b   :  { %3176 = vmatprep.subr.mxu1 %v3607_v0  ;;  %3146 = vmatpush3.msra.mxu0 %v1462_v43  ;;  %v1489_v43 = vld [vmem:[#allocation4 + $0x218] sm:$0xff] }
 0x39c   :  { %3177 = vmatpush3.msra.mxu1 %v1480_v45  ;;  %3147 = vmatprep.subr.mxu0 %v3607_v0 }
 0x39d   :  { %3178 = vmatprep.subr.mxu1 %v3607_v0  ;;  %3148 = vmatpush3.msra.mxu0 %v1461_v46 }
 0x39e   :  { %3179 = vmatpush3.msra.mxu1 %v1479_v48  ;;  %3149 = vmatprep.subr.mxu0 %v3607_v0  ;;  %v1488_v48 = vld [vmem:[#allocation4 + $0x210] sm:$0xff] }
 0x39f   :  { %3180 = vmatprep.subr.mxu1 %v3607_v0  ;;  %3150 = vmatpush3.msra.mxu0 %v1460_v49  ;;  %v1506_v49 = vld [vmem:[#allocation4 + $0x2a0] sm:$0xff] }
 0x3a0   :  { %3181 = vmatpush3.msra.mxu1 %v1478_v51  ;;  %3151 = vmatprep.subr.mxu0 %v3607_v0 }
 0x3a1   :  { %3182 = vmatprep.subr.mxu1 %v3607_v0  ;;  %3152 = vmatpush3.msra.mxu0 %v1459_v52 }
 0x3a2   :  { %3183 = vmatpush3.msra.mxu1 %v1477_v54  ;;  %3153 = vmatprep.subr.mxu0 %v3607_v0  ;;  %v1487_v54 = vld [vmem:[#allocation4 + $0x208] sm:$0xff] }
 0x3a3   :  { %v3455_v59 = vpop.eup %3454  ;;  %3184 = vmatprep.subr.mxu1 %v3607_v0  ;;  %3154 = vmatpush3.msra.mxu0 %v1458_v56  ;;  %v1505_v56 = vld [vmem:[#allocation4 + $0x298] sm:$0xff] }
 0x3a4   :  { %v1392_v61 = vmul.f32 %v3455_v59, %v1366_v39  ;;  %3185 = vmatpush3.msra.mxu1 %v1476_v58  ;;  %3155 = vmatprep.subr.mxu0 %v3607_v0  ;;  %v1491_v39 = vld [vmem:[#allocation4 + $0x228] sm:$0xff] }
 0x3a5   :  { %3186 = vmatprep.subr.mxu1 %v3607_v0  ;;  %3156 = vmatpush3.msra.mxu0 %v1457_v28 }
 0x3a6   :  { %v1400_v1 = vsub.f32 2.0, %v1392_v61  ;;  %3187 = vmatpush3.msra.mxu1 %v1475_v60  ;;  %3157 = vmatprep.subr.mxu0 %v3607_v0  ;;  %v1504_v61 = vld [vmem:[#allocation4 + $0x290] sm:$0xff] }
 0x3a7   :  { %v3457_v3 = vpop.eup %3456  ;;  %3188 = vmatprep.subr.mxu1 %v3607_v0  ;;  %3158 = vmatpush3.msra.mxu0 %v1456_v62 }
 0x3a8   :  { %v1408_v7 = vmul.f32 %v3455_v59, %v1400_v1  ;;  %v1393_v57 = vmul.f32 %v3457_v3, %v1369_v44  ;;  %3189 = vmatpush3.msra.mxu1 %v1474_v63  ;;  %3159 = vmatprep.subr.mxu0 %v3607_v0  ;;  %v1507_v44 = vld [vmem:[#allocation4 + $0x2a8] sm:$0xff]  ;;  %v1486_v59 = vld [vmem:[#allocation4 + $0x200] sm:$0xff] }
 0x3a9   :  { %3190 = vmatprep.subr.mxu1 %v3607_v0  ;;  %3160 = vmatpush3.msra.mxu0 %v1455_v2  ;;  %v1503_v1 = vld [vmem:[#allocation4 + $0x288] sm:$0xff] }
 0x3aa   :  { %v1416_v53 = vmul.f32 %v4033_v47, %v1408_v7  ;;  %v1401_v9 = vsub.f32 2.0, %v1393_v57  ;;  %3191 = vmatpush3.msra.mxu1 %v1473_v5  ;;  %3161 = vmatprep.subr.mxu0 %v3607_v0  ;;  %v1532_v7 = vld [vmem:[#allocation4 + $0x370] sm:$0xff] }
 0x3ab   :  { %3192 = vmatprep.subr.mxu1 %v3607_v0  ;;  %3162 = vmatpush3.msra.mxu0 %v1454_v50 }
 0x3ac   :  { %v2334_v12 = vrot.slane %v1416_v53, 6  ;;  %v1409_v13 = vmul.f32 %v3457_v3, %v1401_v9  ;;  %3193 = vmatpush3.msra.mxu1 %v1472_v8  ;;  %3164 = vmatmul.mubr.f32.vlgmr.msra.gmra.mxu0 %v1416_v53  ;;  %v1533_v3 = vld [vmem:[#allocation4 + $0x378] sm:$0xff]  ;;  %v1531_v8 = vld [vmem:[#allocation4 + $0x368] sm:$0xff]  ;;  %v1548_v9 = vld [vmem:[#allocation4 + $0x3f0] sm:$0xff] }
 0x3ad   :  { %3194 = vmatprep.subr.mxu1 %v3607_v0  ;;  %3201 = vmatprep.subr.mxu0 %v3607_v0 }
 0x3ae   :  { %v1417_v47 = vmul.f32 %v4041_v55, %v1409_v13  ;;  %3195 = vmatpush3.msra.mxu1 %v1471_v10  ;;  %3202 = vmatpush3.msra.mxu0 %v1501_v11  ;;  %v2335_v18 = vsel %vm2154_vm3, %v2334_v12, %v4080_v36  ;;  %v1498_v55 = vld [vmem:[#allocation4 + $0x260] sm:$0xff]  ;;  %v1511_v36 = vld [vmem:[#allocation4 + $0x2c8] sm:$0xff]  ;;  %v1529_v12 = vld [vmem:[#allocation4 + $0x358] sm:$0xff] }
 0x3af   :  { %3196 = vmatprep.subr.mxu1 %v3607_v0  ;;  %3203 = vmatprep.subr.mxu0 %v3607_v0  ;;  %v1530_v10 = vld [vmem:[#allocation4 + $0x360] sm:$0xff]  ;;  %v1547_v11 = vld [vmem:[#allocation4 + $0x3e8] sm:$0xff] }
 0x3b0   :  { %v2336_v21 = vrot.slane %v1417_v47, 5  ;;  %3197 = vmatpush3.msra.mxu1 %v1470_v14  ;;  %3198 = vmatprep.mubr.msk.f32.mxu1 %vm3608_vm0, %v3607_v0  ;;  %v1546_v13 = vld [vmem:[#allocation4 + $0x3e0] sm:$0xff]  ;;  %v1528_v14 = vld [vmem:[#allocation4 + $0x350] sm:$0xff] }
 0x3b1   :  { %3204 = vmatpush3.msra.mxu0 %v1500_v15  ;;  %3199 = vmatmul.mubr.f32.vlgmr.msra.gmra.mxu1 %v1417_v47  ;;  %v1545_v47 = vld [vmem:[#allocation4 + $0x3d8] sm:$0xff]  ;;  %v1527_v15 = vld [vmem:[#allocation4 + $0x348] sm:$0xff] }
 0x3b2   :  { %3205 = vmatprep.subr.mxu0 %v3607_v0  ;;  %3236 = vmatprep.subr.mxu1 %v3607_v0  ;;  %v4119_v25 = vsel %vm2157_vm4, %v2336_v21, %v2335_v18  ;;  %v1544_v18 = vld [vmem:[#allocation4 + $0x3d0] sm:$0xff]  ;;  %v1526_v21 = vld [vmem:[#allocation4 + $0x340] sm:$0xff] }
 0x3b3   :  { %3206 = vmatpush3.msra.mxu0 %v1499_v22  ;;  %3237 = vmatpush3.msra.mxu1 %v1517_v23  ;;  %v1543_v22 = vld [vmem:[#allocation4 + $0x3c8] sm:$0xff]  ;;  %v1525_v23 = vld [vmem:[#allocation4 + $0x338] sm:$0xff] }
 0x3b4   :  { %3207 = vmatprep.subr.mxu0 %v3607_v0  ;;  %3238 = vmatprep.subr.mxu1 %v3607_v0 }
 0x3b5   :  { %3208 = vmatpush3.msra.mxu0 %v1498_v55  ;;  %3239 = vmatpush3.msra.mxu1 %v1516_v24  ;;  %v1542_v55 = vld [vmem:[#allocation4 + $0x3c0] sm:$0xff]  ;;  %v1524_v24 = vld [vmem:[#allocation4 + $0x330] sm:$0xff] }
 0x3b6   :  { %3209 = vmatprep.subr.mxu0 %v3607_v0  ;;  %3240 = vmatprep.subr.mxu1 %v3607_v0 }
 0x3b7   :  { %3210 = vmatpush3.msra.mxu0 %v1497_v17  ;;  %v1372_v30 = vpop.xlane.xlu0 %1371  ;;  %3241 = vmatpush3.msra.mxu1 %v1515_v27  ;;  %v1523_v17 = vld [vmem:[#allocation4 + $0x328] sm:$0xff]  ;;  %v1540_v27 = vld [vmem:[#allocation4 + $0x3b0] sm:$0xff] }
 0x3b8   :  { %3458 = vrcp.f32 %v1372_v30  ;;  %3211 = vmatprep.subr.mxu0 %v3607_v0  ;;  %3242 = vmatprep.subr.mxu1 %v3607_v0 }
 0x3b9   :  { %3212 = vmatpush3.msra.mxu0 %v1496_v20  ;;  %3243 = vmatpush3.msra.mxu1 %v1514_v29  ;;  %v1522_v20 = vld [vmem:[#allocation4 + $0x320] sm:$0xff]  ;;  %v1539_v29 = vld [vmem:[#allocation4 + $0x3a8] sm:$0xff] }
 0x3ba   :  { %v1375_v33 = vpop.xlane.xlu1 %1374  ;;  %3213 = vmatprep.subr.mxu0 %v3607_v0  ;;  %3244 = vmatprep.subr.mxu1 %v3607_v0 }
 0x3bb   :  { %3460 = vrcp.f32 %v1375_v33  ;;  %3214 = vmatpush3.msra.mxu0 %v1495_v31  ;;  %3245 = vmatpush3.msra.mxu1 %v1513_v32  ;;  %v1538_v31 = vld [vmem:[#allocation4 + $0x3a0] sm:$0xff]  ;;  %v1520_v32 = vld [vmem:[#allocation4 + $0x310] sm:$0xff] }
 0x3bc   :  { %3215 = vmatprep.subr.mxu0 %v3607_v0  ;;  %3246 = vmatprep.subr.mxu1 %v3607_v0 }
 0x3bd   :  { %3216 = vmatpush3.msra.mxu0 %v1494_v34  ;;  %3247 = vmatpush3.msra.mxu1 %v1512_v19  ;;  %v1519_v34 = vld [vmem:[#allocation4 + $0x308] sm:$0xff]  ;;  %v1536_v19 = vld [vmem:[#allocation4 + $0x390] sm:$0xff] }
 0x3be   :  { %3217 = vmatprep.subr.mxu0 %v3607_v0  ;;  %3248 = vmatprep.subr.mxu1 %v3607_v0 }
 0x3bf   :  { %3218 = vmatpush3.msra.mxu0 %v1493_v35  ;;  %3249 = vmatpush3.msra.mxu1 %v1511_v36  ;;  %v1518_v35 = vld [vmem:[#allocation4 + $0x300] sm:$0xff]  ;;  %v1535_v36 = vld [vmem:[#allocation4 + $0x388] sm:$0xff] }
 0x3c0   :  { %3219 = vmatprep.subr.mxu0 %v3607_v0  ;;  %3250 = vmatprep.subr.mxu1 %v3607_v0 }
 0x3c1   :  { %3220 = vmatpush3.msra.mxu0 %v1492_v37  ;;  %3251 = vmatpush3.msra.mxu1 %v1510_v38  ;;  %v1534_v37 = vld [vmem:[#allocation4 + $0x380] sm:$0xff] }
 0x3c2   :  { %3221 = vmatprep.subr.mxu0 %v3607_v0  ;;  %3252 = vmatprep.subr.mxu1 %v3607_v0 }
 0x3c3   :  { %3222 = vmatpush3.msra.mxu0 %v1491_v39  ;;  %3253 = vmatpush3.msra.mxu1 %v1509_v40 }
 0x3c4   :  { %3223 = vmatprep.subr.mxu0 %v3607_v0  ;;  %3254 = vmatprep.subr.mxu1 %v3607_v0 }
 0x3c5   :  { %v3459_v45 = vpop.eup %3458  ;;  %3224 = vmatpush3.msra.mxu0 %v1490_v41  ;;  %3255 = vmatpush3.msra.mxu1 %v1508_v42 }
 0x3c6   :  { %v1394_v46 = vmul.f32 %v3459_v45, %v1372_v30  ;;  %3225 = vmatprep.subr.mxu0 %v3607_v0  ;;  %3256 = vmatprep.subr.mxu1 %v3607_v0  ;;  %v1521_v30 = vld [vmem:[#allocation4 + $0x318] sm:$0xff] }
 0x3c7   :  { %3226 = vmatpush3.msra.mxu0 %v1489_v43  ;;  %3257 = vmatpush3.msra.mxu1 %v1507_v44 }
 0x3c8   :  { %v3461_v51 = vpop.eup %3460  ;;  %v1402_v52 = vsub.f32 2.0, %v1394_v46  ;;  %3227 = vmatprep.subr.mxu0 %v3607_v0  ;;  %3258 = vmatprep.subr.mxu1 %v3607_v0 }
 0x3c9   :  { %v1395_v58 = vmul.f32 %v3461_v51, %v1375_v33  ;;  %3228 = vmatpush3.msra.mxu0 %v1488_v48  ;;  %3259 = vmatpush3.msra.mxu1 %v1506_v49  ;;  %v1537_v33 = vld [vmem:[#allocation4 + $0x398] sm:$0xff] }
 0x3ca   :  { %v1410_v28 = vmul.f32 %v3459_v45, %v1402_v52  ;;  %3229 = vmatprep.subr.mxu0 %v3607_v0  ;;  %3260 = vmatprep.subr.mxu1 %v3607_v0  ;;  %v2141_v48 = vld [vmem:[#allocation10 + $0x78] sm:$0xff] }
 0x3cb   :  { %v1403_v60 = vsub.f32 2.0, %v1395_v58  ;;  %3230 = vmatpush3.msra.mxu0 %v1487_v54  ;;  %3261 = vmatpush3.msra.mxu1 %v1505_v56  ;;  %v2139_v54 = vld [vmem:[#allocation10 + $0x68] sm:$0xff] }
 0x3cc   :  { %v1418_v62 = vmul.f32 %v4053_v4, %v1410_v28  ;;  %3231 = vmatprep.subr.mxu0 %v3607_v0  ;;  %3262 = vmatprep.subr.mxu1 %v3607_v0  ;;  %v1502_v4 = vld [vmem:[#allocation4 + $0x280] sm:$0xff]  ;;  %v2125_v28 = vld [vmem:[#allocation9 + $0x78] sm:$0xff] }
 0x3cd   :  { %v1411_v63 = vmul.f32 %v3461_v51, %v1403_v60  ;;  %3232 = vmatpush3.msra.mxu0 %v1486_v59  ;;  %3233 = vmatprep.mubr.msk.f32.mxu0 %vm3608_vm0, %v3607_v0  ;;  %v2140_v51 = vld [vmem:[#allocation10 + $0x70] sm:$0xff] }
 0x3ce   :  { %v2338_v2 = vrot.slane %v1418_v62, 4  ;;  %3263 = vmatpush3.msra.mxu1 %v1504_v61  ;;  %3234 = vmatmul.mubr.f32.vlgmr.msra.gmra.mxu0 %v1418_v62  ;;  %v2124_v60 = vld [vmem:[#allocation9 + $0x70] sm:$0xff]  ;;  %v2137_v61 = vld [vmem:[#allocation10 + $0x58] sm:$0xff]  ;;  %v2123_v62 = vld [vmem:[#allocation9 + $0x68] sm:$0xff] }
 0x3cf   :  { %v1419_v5 = vmul.f32 %v4057_v6, %v1411_v63  ;;  %3264 = vmatprep.subr.mxu1 %v3607_v0  ;;  %3268 = vmatprep.mubr.msk.f32.mxu1 %vm3608_vm0, %v3607_v0  ;;  %v1549_v6 = vld [vmem:[#allocation4 + $0x3f8] sm:$0xff] }
 0x3d0   :  { %3265 = vmatpush3.msra.mxu1 %v1503_v1  ;;  %3271 = vmatprep.subr.mxu0 %v3607_v0  ;;  %v2339_v57 = vsel %vm2160_vm5, %v2338_v2, %v4119_v25  ;;  %v1541_v25 = vld [vmem:[#allocation4 + $0x3b8] sm:$0xff]  ;;  %v2136_v1 = vld [vmem:[#allocation10 + $0x50] sm:$0xff]  ;;  %v2122_v2 = vld [vmem:[#allocation9 + $0x60] sm:$0xff] }
 0x3d1   :  { %v2340_v50 = vrot.slane %v1419_v5, 3  ;;  %3266 = vmatprep.subr.mxu1 %v3607_v0  ;;  %3272 = vmatpush3.msra.mxu0 %v1533_v3  ;;  %v2135_v3 = vld [vmem:[#allocation10 + $0x48] sm:$0xff] }
 0x3d2   :  { %3267 = vmatpush3.msra.mxu1 %v1502_v4  ;;  %3273 = vmatprep.subr.mxu0 %v3607_v0  ;;  %v2134_v4 = vld [vmem:[#allocation10 + $0x40] sm:$0xff] }
 0x3d3   :  { %3269 = vmatmul.mubr.f32.vlgmr.msra.gmra.mxu1 %v1419_v5  ;;  %3274 = vmatpush3.msra.mxu0 %v1532_v7  ;;  %v4160_v53 = vsel %vm2163_vm6, %v2340_v50, %v2339_v57  ;;  %v2121_v5 = vld [vmem:[#allocation9 + $0x58] sm:$0xff]  ;;  %v2120_v7 = vld [vmem:[#allocation9 + $0x50] sm:$0xff]  ;;  %v2119_v50 = vld [vmem:[#allocation9 + $0x48] sm:$0xff] }
 0x3d4   :  { %3306 = vmatprep.subr.mxu1 %v3607_v0  ;;  %3275 = vmatprep.subr.mxu0 %v3607_v0  ;;  %v2133_v57 = vld [vmem:[#allocation10 + $0x38] sm:$0xff] }
 0x3d5   :  { %3307 = vmatpush3.msra.mxu1 %v1549_v6  ;;  %3276 = vmatpush3.msra.mxu0 %v1531_v8  ;;  %v2132_v6 = vld [vmem:[#allocation10 + $0x30] sm:$0xff]  ;;  %v2118_v8 = vld [vmem:[#allocation9 + $0x40] sm:$0xff] }
 0x3d6   :  { %3308 = vmatprep.subr.mxu1 %v3607_v0  ;;  %3277 = vmatprep.subr.mxu0 %v3607_v0 }
 0x3d7   :  { %3309 = vmatpush3.msra.mxu1 %v1548_v9  ;;  %3278 = vmatpush3.msra.mxu0 %v1530_v10  ;;  %v2117_v9 = vld [vmem:[#allocation9 + $0x38] sm:$0xff]  ;;  %v2130_v10 = vld [vmem:[#allocation10 + $0x20] sm:$0xff] }
 0x3d8   :  { %3310 = vmatprep.subr.mxu1 %v3607_v0  ;;  %3279 = vmatprep.subr.mxu0 %v3607_v0 }
 0x3d9   :  { %3311 = vmatpush3.msra.mxu1 %v1547_v11  ;;  %3280 = vmatpush3.msra.mxu0 %v1529_v12  ;;  %v2116_v11 = vld [vmem:[#allocation9 + $0x30] sm:$0xff]  ;;  %v2115_v12 = vld [vmem:[#allocation9 + $0x28] sm:$0xff] }
 0x3da   :  { %3312 = vmatprep.subr.mxu1 %v3607_v0  ;;  %3281 = vmatprep.subr.mxu0 %v3607_v0 }
 0x3db   :  { %3313 = vmatpush3.msra.mxu1 %v1546_v13  ;;  %3282 = vmatpush3.msra.mxu0 %v1528_v14  ;;  %v2114_v13 = vld [vmem:[#allocation9 + $0x20] sm:$0xff]  ;;  %v2113_v14 = vld [vmem:[#allocation9 + $0x18] sm:$0xff] }
 0x3dc   :  { %3314 = vmatprep.subr.mxu1 %v3607_v0  ;;  %3283 = vmatprep.subr.mxu0 %v3607_v0 }
 0x3dd   :  { %3315 = vmatpush3.msra.mxu1 %v1545_v47  ;;  %3284 = vmatpush3.msra.mxu0 %v1527_v15  ;;  %v2112_v47 = vld [vmem:[#allocation9 + $0x10] sm:$0xff] }
 0x3de   :  { %3316 = vmatprep.subr.mxu1 %v3607_v0  ;;  %3285 = vmatprep.subr.mxu0 %v3607_v0 }
 0x3df   :  { %3317 = vmatpush3.msra.mxu1 %v1544_v18  ;;  %3286 = vmatpush3.msra.mxu0 %v1526_v21  ;;  %v2111_v18 = vld [vmem:[#allocation9 + $0x8] sm:$0xff] }
 0x3e0   :  { %3318 = vmatprep.subr.mxu1 %v3607_v0  ;;  %3287 = vmatprep.subr.mxu0 %v3607_v0 }
 0x3e1   :  { %3319 = vmatpush3.msra.mxu1 %v1543_v22  ;;  %3288 = vmatpush3.msra.mxu0 %v1525_v23  ;;  %v2110_v22 = vld [vmem:[#allocation9] sm:$0xff] }
 0x3e2   :  { %3320 = vmatprep.subr.mxu1 %v3607_v0  ;;  %3289 = vmatprep.subr.mxu0 %v3607_v0 }
 0x3e3   :  { %3321 = vmatpush3.msra.mxu1 %v1542_v55  ;;  %3290 = vmatpush3.msra.mxu0 %v1524_v24 }
 0x3e4   :  { %3322 = vmatprep.subr.mxu1 %v3607_v0  ;;  %3291 = vmatprep.subr.mxu0 %v3607_v0 }
 0x3e5   :  { %3323 = vmatpush3.msra.mxu1 %v1541_v25  ;;  %3292 = vmatpush3.msra.mxu0 %v1523_v17  ;;  %v3468_v17 = vld [vmem:[%s4273_s14] sm:$0xff] }
 0x3e6   :  { %3324 = vmatprep.subr.mxu1 %v3607_v0  ;;  %3293 = vmatprep.subr.mxu0 %v3607_v0 }
 0x3e7   :  { %3325 = vmatpush3.msra.mxu1 %v1540_v27  ;;  %3294 = vmatpush3.msra.mxu0 %v1522_v20 }
 0x3e8   :  { %3326 = vmatprep.subr.mxu1 %v3607_v0  ;;  %3295 = vmatprep.subr.mxu0 %v3607_v0 }
 0x3e9   :  { %3327 = vmatpush3.msra.mxu1 %v1539_v29  ;;  %3296 = vmatpush3.msra.mxu0 %v1521_v30 }
 0x3ea   :  { %3328 = vmatprep.subr.mxu1 %v3607_v0  ;;  %3297 = vmatprep.subr.mxu0 %v3607_v0 }
 0x3eb   :  { %3329 = vmatpush3.msra.mxu1 %v1538_v31  ;;  %3298 = vmatpush3.msra.mxu0 %v1520_v32  ;;  %v2129_v31 = vld [vmem:[#allocation10 + $0x18] sm:$0xff]  ;;  %v2128_v32 = vld [vmem:[#allocation10 + $0x10] sm:$0xff] }
 0x3ec   :  { %3330 = vmatprep.subr.mxu1 %v3607_v0  ;;  %3299 = vmatprep.subr.mxu0 %v3607_v0 }
 0x3ed   :  { %3331 = vmatpush3.msra.mxu1 %v1537_v33  ;;  %3300 = vmatpush3.msra.mxu0 %v1519_v34 }
 0x3ee   :  { %3332 = vmatprep.subr.mxu1 %v3607_v0  ;;  %3301 = vmatprep.subr.mxu0 %v3607_v0 }
 0x3ef   :  { %3333 = vmatpush3.msra.mxu1 %v1536_v19  ;;  %3302 = vmatpush3.msra.mxu0 %v1518_v35 }
 0x3f0   :  { %3303 = vmatprep.mubr.msk.f32.mxu0 %vm3608_vm0, %v3607_v0  ;;  %3334 = vmatprep.subr.mxu1 %v3607_v0 }
 0x3f1   :  { %3335 = vmatpush3.msra.mxu1 %v1535_v36  ;;  %3338 = vmatprep.mubr.msk.f32.mxu1 %vm3608_vm0, %v3607_v0  ;;  %v2127_v36 = vld [vmem:[#allocation10 + $0x8] sm:$0xff] }
 0x3f2   :  { %3336 = vmatprep.subr.mxu1 %v3607_v0  ;;  %3341 = vmatprep.subr.mxu0 %v3607_v0 }
 0x3f3   :  { %3337 = vmatpush3.msra.mxu1 %v1534_v37  ;;  %v2126_v37 = vld [vmem:[#allocation10] sm:$0xff] }
 0x3f4   :  { %3376 = vmatprep.subr.mxu1 %v3607_v0 }
 0x416   :  { %v1378_v38 = vpop.xlane.xlu0 %1377 }
 0x417   :  { %3462 = vrcp.f32 %v1378_v38 }
 0x41c   :  { %v1381_v39 = vpop.xlane.xlu1 %1380 }
 0x41d   :  { %3464 = vrcp.f32 %v1381_v39 }
 0x424   :  { %v3463_v40 = vpop.eup %3462 }
 0x425   :  { %v1396_v41 = vmul.f32 %v3463_v40, %v1378_v38 }
 0x427   :  { %v1404_v42 = vsub.f32 2.0, %v1396_v41 }
 0x429   :  { %v1412_v43 = vmul.f32 %v3463_v40, %v1404_v42 }
 0x42a   :  { %v3465_v44 = vpop.eup %3464 }
 0x42b   :  { %v1420_v45 = vmul.f32 %v4064_v26, %v1412_v43  ;;  %v1397_v46 = vmul.f32 %v3465_v44, %v1381_v39  ;;  %v2138_v26 = vld [vmem:[#allocation10 + $0x60] sm:$0xff] }
 0x42d   :  { %v1405_v49 = vsub.f32 2.0, %v1397_v46  ;;  %3304 = vmatmul.mubr.f32.vlgmr.msra.gmra.mxu0 %v1420_v45  ;;  %v2342_v56 = vrot.slane %v1420_v45, 2 }
 0x42e   :  { %3342 = vmatpush3.msra.mxu0 %v2141_v48  ;;  %3373 = vmatprep.mubr.msk.f32.mxu0 %vm3608_vm0, %v3607_v0 }
 0x42f   :  { %v1413_v52 = vmul.f32 %v3465_v44, %v1405_v49  ;;  %3343 = vmatprep.subr.mxu0 %v3607_v0 }
 0x430   :  { %3344 = vmatpush3.msra.mxu0 %v2140_v51 }
 0x431   :  { %v1421_v58 = vmul.f32 %v4072_v16, %v1413_v52  ;;  %3345 = vmatprep.subr.mxu0 %v3607_v0  ;;  %v2343_v16 = vsel %vm2166_vm7, %v2342_v56, %v4160_v53  ;;  %v2131_v53 = vld [vmem:[#allocation10 + $0x28] sm:$0xff] }
 0x432   :  { %3346 = vmatpush3.msra.mxu0 %v2139_v54 }
 0x433   :  { %v2344_v59 = vrot.slane %v1421_v58, 1  ;;  %3339 = vmatmul.mubr.f32.vlgmr.msra.gmra.mxu1 %v1421_v58  ;;  %3347 = vmatprep.subr.mxu0 %v3607_v0 }
 0x434   :  { %3377 = vmatpush3.msra.mxu1 %v2125_v28  ;;  %3408 = vmatprep.mubr.msk.f32.mxu1 %vm3608_vm0, %v3607_v0 }
 0x435   :  { %3378 = vmatprep.subr.mxu1 %v3607_v0  ;;  %3348 = vmatpush3.msra.mxu0 %v2138_v26  ;;  %v2345_v63 = vsel %vm2169_vm8, %v2344_v59, %v2343_v16  ;;  %v2370_v59 = vld [vmem:[%s4270_s11] ss:$0 sm:$0xff] }
 0x436   :  { %3379 = vmatpush3.msra.mxu1 %v2124_v60  ;;  %3349 = vmatprep.subr.mxu0 %v3607_v0  ;;  %2347 = vst [vmem:[%s4274_s15] sm:$0xff] %v2345_v63 }
 0x437   :  { %3380 = vmatprep.subr.mxu1 %v3607_v0  ;;  %3350 = vmatpush3.msra.mxu0 %v2137_v61 }
 0x438   :  { %3381 = vmatpush3.msra.mxu1 %v2123_v62  ;;  %3351 = vmatprep.subr.mxu0 %v3607_v0 }
 0x439   :  { %3382 = vmatprep.subr.mxu1 %v3607_v0  ;;  %3352 = vmatpush3.msra.mxu0 %v2136_v1 }
 0x43a   :  { %3383 = vmatpush3.msra.mxu1 %v2122_v2  ;;  %3353 = vmatprep.subr.mxu0 %v3607_v0 }
 0x43b   :  { %3384 = vmatprep.subr.mxu1 %v3607_v0  ;;  %3354 = vmatpush3.msra.mxu0 %v2135_v3 }
 0x43c   :  { %3385 = vmatpush3.msra.mxu1 %v2121_v5  ;;  %3355 = vmatprep.subr.mxu0 %v3607_v0 }
 0x43d   :  { %3386 = vmatprep.subr.mxu1 %v3607_v0  ;;  %3356 = vmatpush3.msra.mxu0 %v2134_v4 }
 0x43e   :  { %3387 = vmatpush3.msra.mxu1 %v2120_v7  ;;  %3357 = vmatprep.subr.mxu0 %v3607_v0 }
 0x43f   :  { %3388 = vmatprep.subr.mxu1 %v3607_v0  ;;  %3358 = vmatpush3.msra.mxu0 %v2133_v57 }
 0x440   :  { %3389 = vmatpush3.msra.mxu1 %v2119_v50  ;;  %3359 = vmatprep.subr.mxu0 %v3607_v0 }
 0x441   :  { %3390 = vmatprep.subr.mxu1 %v3607_v0  ;;  %3360 = vmatpush3.msra.mxu0 %v2132_v6 }
 0x442   :  { %3391 = vmatpush3.msra.mxu1 %v2118_v8  ;;  %3361 = vmatprep.subr.mxu0 %v3607_v0 }
 0x443   :  { %3392 = vmatprep.subr.mxu1 %v3607_v0  ;;  %3362 = vmatpush3.msra.mxu0 %v2131_v53 }
 0x444   :  { %3393 = vmatpush3.msra.mxu1 %v2117_v9  ;;  %3363 = vmatprep.subr.mxu0 %v3607_v0 }
 0x445   :  { %3394 = vmatprep.subr.mxu1 %v3607_v0  ;;  %3364 = vmatpush3.msra.mxu0 %v2130_v10 }
 0x446   :  { %3395 = vmatpush3.msra.mxu1 %v2116_v11  ;;  %3365 = vmatprep.subr.mxu0 %v3607_v0 }
 0x447   :  { %3396 = vmatprep.subr.mxu1 %v3607_v0  ;;  %3366 = vmatpush3.msra.mxu0 %v2129_v31 }
 0x448   :  { %3397 = vmatpush3.msra.mxu1 %v2115_v12  ;;  %3367 = vmatprep.subr.mxu0 %v3607_v0 }
 0x449   :  { %3398 = vmatprep.subr.mxu1 %v3607_v0  ;;  %3368 = vmatpush3.msra.mxu0 %v2128_v32 }
 0x44a   :  { %3399 = vmatpush3.msra.mxu1 %v2114_v13  ;;  %3369 = vmatprep.subr.mxu0 %v3607_v0 }
 0x44b   :  { %3400 = vmatprep.subr.mxu1 %v3607_v0  ;;  %3370 = vmatpush3.msra.mxu0 %v2127_v36 }
 0x44c   :  { %3401 = vmatpush3.msra.mxu1 %v2113_v14  ;;  %v1616_v15 = vpop.f32.mrf.mxu0  ;;  %3371 = vmatprep.subr.mxu0 %v3607_v0 }
 0x44d   :  { %3402 = vmatprep.subr.mxu1 %v3607_v0  ;;  %3372 = vmatpush3.msra.mxu0 %v2126_v37 }
 0x44e   :  { %3403 = vmatpush3.msra.mxu1 %v2112_v47  ;;  %v3095_v21 = vpop.f32.mrf.mxu0 }
 0x44f   :  { %3404 = vmatprep.subr.mxu1 %v3607_v0 }
 0x450   :  { %3405 = vmatpush3.msra.mxu1 %v2111_v18  ;;  %v1686_v23 = vpop.f32.mrf.mxu1 }
 0x451   :  { %3406 = vmatprep.subr.mxu1 %v3607_v0  ;;  %v2150_v55 = vrot.slane %v1686_v23, 7 }
 0x452   :  { %3407 = vmatpush3.msra.mxu1 %v2110_v22  ;;  %v3130_v24 = vpop.f32.mrf.mxu1 }
 0x453   :  { %v2152_v25 = vsel %vm2151_vm2, %v2150_v55, %v1616_v15  ;;  %3409 = vmatmul.mubr.f32.vlgmr.msra.gmra.mxu1 %v3468_v17 }
 0x46c   :  { %v1756_v27 = vpop.f32.mrf.mxu0 }
 0x46d   :  { %v2153_v20 = vrot.slane %v1756_v27, 6 }
 0x46e   :  { %v3165_v29 = vpop.f32.mrf.mxu0 }
 0x46f   :  { %v2155_v30 = vsel %vm2154_vm3, %v2153_v20, %v2152_v25 }
 0x471   :  { %v1826_v33 = vpop.f32.mrf.mxu1 }
 0x472   :  { %v2156_v34 = vrot.slane %v1826_v33, 5 }
 0x473   :  { %v3200_v19 = vpop.f32.mrf.mxu1 }
 0x474   :  { %v2158_v35 = vsel %vm2157_vm4, %v2156_v34, %v2155_v30 }
 0x48e   :  { %v1896_v38 = vpop.f32.mrf.mxu0 }
 0x48f   :  { %v2159_v39 = vrot.slane %v1896_v38, 4 }
 0x490   :  { %v3235_v40 = vpop.f32.mrf.mxu0 }
 0x491   :  { %v2161_v41 = vsel %vm2160_vm5, %v2159_v39, %v2158_v35 }
 0x493   :  { %v1966_v42 = vpop.f32.mrf.mxu1 }
 0x494   :  { %v2162_v43 = vrot.slane %v1966_v42, 3 }
 0x495   :  { %v3270_v44 = vpop.f32.mrf.mxu1 }
 0x496   :  { %v2164_v45 = vsel %vm2163_vm6, %v2162_v43, %v2161_v41 }
 0x4ed   :  { %v2036_v46 = vpop.f32.mrf.mxu0 }
 0x4ee   :  { %v2165_v49 = vrot.slane %v2036_v46, 2 }
 0x4ef   :  { %v3305_v48 = vpop.f32.mrf.mxu0 }
 0x4f0   :  { %v2167_v54 = vsel %vm2166_vm7, %v2165_v49, %v2164_v45 }
 0x4f3   :  { %v2106_v51 = vpop.f32.mrf.mxu1 }
 0x4f4   :  { %v2168_v52 = vrot.slane %v2106_v51, 1 }
 0x4f5   :  { %v3340_v56 = vpop.f32.mrf.mxu1 }
 0x4f6   :  { %v2170_v0 = vsel %vm2169_vm8, %v2168_v52, %v2167_v54 }
 0x4f7   :  { %3374 = vmatmul.mubr.f32.vlgmr.msra.gmra.mxu0 %v2170_v0  ;;  %2322 = vst [vmem:[%s4272_s13] sm:$0xff] %v2170_v0 }
 0x513   :  { %v2308_v58 = vpop.f32.mrf.mxu1 }
 0x515   :  { %v3410_v28 = vpop.f32.mrf.mxu1 }
 0x5b7   :  { %v2238_v26 = vpop.f32.mrf.mxu0 }
 0x5b8   :  { %v2309_v60 = vadd.f32 %v2308_v58, %v2238_v26 }
 0x5b9   :  { %v3375_v61 = vpop.f32.mrf.mxu0 }
 0x5ba   :  { %v2319_v16 = vadd.f32 %v2370_v59, %v2309_v60 }
 0x5bc   :  { %3466 = vtanh.f32 %v2319_v16 }
 0x5c9   :  { %v3467_v62 = vpop.eup %3466 }
 0x5ca   :  { %2321 = vst [vmem:[%s4271_s12] sm:$0xff] %v3467_v62 }
 0x5cb   :  { %2364 = vsyncpa [#allocation3], 1 }
 0x5cc   :  { %2365 = vsyncpa [#allocation5], 1 }
 0x5cd   :  { %2366 = vsyncpa [#allocation8], 1 }
 0x5ce   :  { %2367 = vsyncpa [#allocation11], 1 }

</bundles_post_ra>
